<compile_context>
chip_gen: v5e
topology: v5e:2x2
jax: 0.10.0
libtpu: 0.0.40
codegen_flags: <defaults>
</compile_context>

<pallas_src>
import functools
import math

import jax
import jax.numpy as jnp
from jax.experimental import pallas as pl
from jax.experimental.pallas import tpu as pltpu


def _layer_norm(z, gamma, beta, eps):
    mean = jnp.mean(z, axis=-1, keepdims=True)
    centered = z - mean
    var = jnp.mean(centered * centered, axis=-1, keepdims=True)
    return centered * jax.lax.rsqrt(var + eps) * gamma + beta


def _self_attention_cell_kernel(
    x_ref,
    g1_ref, b1_ref,
    wqkv_ref, bqkv_ref,
    g2_ref, b2_ref,
    w_fc1_ref, b_fc1_ref, w_fc2_ref, b_fc2_ref,
    o_ref,
    att_ref,                      # VMEM scratch (tb*s, e): concat-free head accum
    *, num_heads, eps, approx_recip):
    tb, s, e = x_ref.shape
    d_k = e // num_heads
    mxu_dt = wqkv_ref.dtype       # MXU operand dtype (f32 or bf16); accum stays f32

    # ---- LayerNorm 1 (f32) + fused QKV projection (one wide MXU matmul) ----
    # NOTE: merging (tb, s) -> tb*s rows is layout-free when s % 8 == 0.
    x2d = x_ref[...].astype(jnp.float32).reshape(tb * s, e)
    xn1 = _layer_norm(x2d, g1_ref[...], b1_ref[...], eps)
    qkv = jnp.dot(xn1.astype(mxu_dt), wqkv_ref[...],
                  preferred_element_type=jnp.float32) + bqkv_ref[...]

    # ---- Multi-head attention ----
    # 1/sqrt(d_k) is already folded into the Q weights/bias (wrapper side).
    # Each head writes straight into att_ref so its scores/p temporaries die
    # immediately (no 8-wide concatenate, bounded liveness).
    for hd in range(num_heads):
        lo = hd * d_k
        q_h = qkv[:, lo:lo + d_k].reshape(tb, s, d_k)
        k_h = qkv[:, e + lo:e + lo + d_k].reshape(tb, s, d_k)
        v_h = qkv[:, 2 * e + lo:2 * e + lo + d_k].reshape(tb, s, d_k)
        scores = jnp.einsum('bqd,bkd->bqk', q_h.astype(mxu_dt), k_h.astype(mxu_dt),
                            preferred_element_type=jnp.float32)
        m = jnp.max(scores, axis=-1, keepdims=True)
        p = jnp.exp(scores - m)                       # unnormalized softmax numerator
        l = jnp.sum(p, axis=-1, keepdims=True)
        o_h = jnp.einsum('bqk,bkd->bqd', p.astype(mxu_dt), v_h.astype(mxu_dt),
                         preferred_element_type=jnp.float32)
        # deferred normalization: divide the small (tb,s,d_k) tensor, not (tb,s,s)
        o_h = o_h * pl.reciprocal(l, approx=approx_recip)
        att_ref[:, lo:lo + d_k] = o_h.reshape(tb * s, d_k)

    att2d = att_ref[...]

    # ---- LayerNorm 2 + FeedForward + residual ----
    xn2 = _layer_norm(att2d, g2_ref[...], b2_ref[...], eps)
    h1 = jnp.dot(xn2.astype(mxu_dt), w_fc1_ref[...],
                 preferred_element_type=jnp.float32) + b_fc1_ref[...]
    h1 = jnp.maximum(h1, 0.0)
    ff = jnp.dot(h1.astype(mxu_dt), w_fc2_ref[...],
                 preferred_element_type=jnp.float32) + b_fc2_ref[...]

    o_ref[...] = (att2d + ff).reshape(tb, s, e).astype(o_ref.dtype)


def _f32(a):
    a = jnp.asarray(a)
    return a if a.dtype == jnp.float32 else a.astype(jnp.float32)


def _largest_divisor_leq(n, cap):
    cap = max(1, min(int(cap), int(n)))
    for d in range(cap, 0, -1):
        if n % d == 0:
            return d
    return 1


def self_attention_cell_forward(
    x,
    gamma1, beta1,
    wq, bq, wk, bk, wv, bv,
    gamma2, beta2,
    w_fc1, b_fc1, w_fc2, b_fc2,
    *, num_heads=8, eps=1e-5, batch_block=None, mxu_dtype=None):
    """x: [batch, seq, embed] -> [batch, seq, embed] (same dtype as x)."""
    b, s, e = x.shape
    hid = w_fc1.shape[1]
    assert e % num_heads == 0, (e, num_heads)
    d_k = e // num_heads

    # bf16 MXU operands when the model runs in bf16; exact f32 otherwise.
    if mxu_dtype is None:
        mxu_dtype = jnp.bfloat16 if x.dtype == jnp.bfloat16 else jnp.float32
    out_dtype = x.dtype

    # Fused QKV weight/bias; 1/sqrt(d_k) folded into the Q projection so the
    # (s,s) score tensor never needs a scale multiply. (In a real model this
    # fusion would be done once at load time, not per call.)
    scale = 1.0 / math.sqrt(d_k)
    wqkv = jnp.concatenate([_f32(wq) * scale, _f32(wk), _f32(wv)], axis=1).astype(mxu_dtype)
    bqkv = jnp.concatenate([_f32(bq) * scale, _f32(bk), _f32(bv)]).reshape(1, 3 * e)

    g1 = _f32(gamma1).reshape(1, e)
    bt1 = _f32(beta1).reshape(1, e)
    g2 = _f32(gamma2).reshape(1, e)
    bt2 = _f32(beta2).reshape(1, e)
    w1 = _f32(w_fc1).astype(mxu_dtype)
    bf1 = _f32(b_fc1).reshape(1, hid)
    w2 = _f32(w_fc2).astype(mxu_dtype)
    bf2 = _f32(b_fc2).reshape(1, e)

    # --- VMEM-aware batch blocking --------------------------------------
    x_item = jnp.dtype(x.dtype).itemsize
    o_item = jnp.dtype(out_dtype).itemsize
    # per batch-row bytes: double-buffered x/out streams + f32 intermediates
    # (xn1/qkv/att/xn2/ff ~ 6e per token, FFN hidden, one head's scores + p).
    per_row = s * (2 * e * (x_item + o_item) + 4 * (6 * e + hid + 2 * s))
    budget = 16 * 1024 * 1024          # safe under scoped VMEM on v5e/v6e/v7x
    if batch_block is None:
        cap = max(1, budget // max(per_row, 1))
        if b > 1:
            # keep >= 2 grid steps so the "parallel" batch axis can feed both
            # TensorCores on v7x (harmless on single-TC v5e/v6e).
            cap = min(cap, max(1, b // 2))
        batch_block = _largest_divisor_leq(b, cap)   # divides b -> no jnp.pad of x
    assert b % batch_block == 0, (b, batch_block)
    n_blocks = b // batch_block

    # explicit scoped-VMEM limit: resident weights + streamed blocks + headroom
    w_bytes = sum(int(a.size) * jnp.dtype(a.dtype).itemsize
                  for a in (wqkv, bqkv, w1, bf1, w2, bf2, g1, bt1, g2, bt2))
    need = w_bytes + batch_block * per_row
    vmem_limit = int(min(56 * 1024 * 1024, max(24 * 1024 * 1024, 2 * need)))

    kernel = functools.partial(
        _self_attention_cell_kernel,
        num_heads=num_heads, eps=eps,
        approx_recip=(jnp.dtype(mxu_dtype) == jnp.dtype(jnp.bfloat16)))

    # Weights / LN params stay VMEM-resident across the whole grid
    # (index_map always returns block 0); only x and out stream per step.
    def resident(shape):
        return pl.BlockSpec(shape, lambda i, _n=len(shape): (0,) * _n)

    out = pl.pallas_call(
        kernel,
        out_shape=jax.ShapeDtypeStruct((b, s, e), out_dtype),
        grid_spec=pltpu.PrefetchScalarGridSpec(
            num_scalar_prefetch=0,
            grid=(n_blocks,),
            in_specs=[
                pl.BlockSpec((batch_block, s, e), lambda i: (i, 0, 0)),  # x stream
                resident((1, e)), resident((1, e)),                      # LN1 gamma/beta
                resident((e, 3 * e)), resident((1, 3 * e)),              # fused Wqkv, bqkv
                resident((1, e)), resident((1, e)),                      # LN2 gamma/beta
                resident((e, hid)), resident((1, hid)),                  # fc1 W, b
                resident((hid, e)), resident((1, e)),                    # fc2 W, b
            ],
            out_specs=pl.BlockSpec((batch_block, s, e), lambda i: (i, 0, 0)),
            scratch_shapes=[pltpu.VMEM((batch_block * s, e), jnp.float32)],
        ),
        compiler_params=pltpu.CompilerParams(
            dimension_semantics=("parallel",),   # shard batch blocks across TCs
            vmem_limit_bytes=vmem_limit,
        ),
    )(x, g1, bt1, wqkv, bqkv, g2, bt2, w1, bf1, w2, bf2)

    return out


def _reference(x, gamma1, beta1, wq, bq, wk, bk, wv, bv,
               gamma2, beta2, w_fc1, b_fc1, w_fc2, b_fc2,
               num_heads=8, eps=1e-5):
    def ln(z, g, bb):
        m = jnp.mean(z, axis=-1, keepdims=True)
        v = jnp.mean((z - m) ** 2, axis=-1, keepdims=True)
        return (z - m) / jnp.sqrt(v + eps) * g + bb

    bsz, s, e = x.shape
    d_k = e // num_heads
    xn = ln(x, gamma1, beta1)
    q = xn @ wq + bq
    k = xn @ wk + bk
    v = xn @ wv + bv

    def split(t):
        return t.reshape(bsz, s, num_heads, d_k).transpose(0, 2, 1, 3)

    qh, kh, vh = split(q), split(k), split(v)
    scores = jnp.einsum('bhqd,bhkd->bhqk', qh, kh) / math.sqrt(d_k)
    p = jax.nn.softmax(scores, axis=-1)
    att = jnp.einsum('bhqk,bhkd->bhqd', p, vh).transpose(0, 2, 1, 3).reshape(bsz, s, e)
    xn2 = ln(att, gamma2, beta2)
    ff = jnp.maximum(xn2 @ w_fc1 + b_fc1, 0.0) @ w_fc2 + b_fc2
    return att + ff


if __name__ == "__main__":
    batch, seq = 2, 8
    embed_size, num_heads = 64, 8          # d_k = 8
    mlp_hidden = 4 * embed_size            # mlp_ratio = 4

    key = jax.random.PRNGKey(0)
    ks = jax.random.split(key, 16)

    x = jax.random.normal(ks[0], (batch, seq, embed_size), jnp.float32)

    def lin(kw, kb, fan_in, fan_out):
        w = jax.random.normal(kw, (fan_in, fan_out), jnp.float32) / math.sqrt(fan_in)
        b = 0.01 * jax.random.normal(kb, (fan_out,), jnp.float32)
        return w, b

    wq, bq = lin(ks[1], ks[2], embed_size, embed_size)
    wk, bk = lin(ks[3], ks[4], embed_size, embed_size)
    wv, bv = lin(ks[5], ks[6], embed_size, embed_size)
    w_fc1, b_fc1 = lin(ks[7], ks[8], embed_size, mlp_hidden)
    w_fc2, b_fc2 = lin(ks[9], ks[10], mlp_hidden, embed_size)

    gamma1 = jnp.ones((embed_size,), jnp.float32) + 0.01 * jax.random.normal(ks[11], (embed_size,), jnp.float32)
    beta1 = 0.01 * jax.random.normal(ks[12], (embed_size,), jnp.float32)
    gamma2 = jnp.ones((embed_size,), jnp.float32) + 0.01 * jax.random.normal(ks[13], (embed_size,), jnp.float32)
    beta2 = 0.01 * jax.random.normal(ks[14], (embed_size,), jnp.float32)

    ref = _reference(x, gamma1, beta1, wq, bq, wk, bk, wv, bv,
                     gamma2, beta2, w_fc1, b_fc1, w_fc2, b_fc2,
                     num_heads=num_heads)

    # f32 path (exact-parity mode): default heuristic picks batch_block=1 here,
    # i.e. grid=(2,) -> exercises the pipelined / megacore-parallel row grid.
    out = self_attention_cell_forward(
        x, gamma1, beta1, wq, bq, wk, bk, wv, bv,
        gamma2, beta2, w_fc1, b_fc1, w_fc2, b_fc2,
        num_heads=num_heads)
    out = jax.block_until_ready(out)

    assert out.shape == (batch, seq, embed_size), out.shape
    assert out.dtype == x.dtype, out.dtype
    max_err = float(jnp.max(jnp.abs(out - ref)))
    assert jnp.allclose(out, ref, atol=1e-4, rtol=1e-4), max_err

    # bf16 path: bf16 MXU operands + bf16 streamed x/out, f32 LN/softmax/accum.
    x_bf = x.astype(jnp.bfloat16)
    out_bf = self_attention_cell_forward(
        x_bf, gamma1, beta1, wq, bq, wk, bk, wv, bv,
        gamma2, beta2, w_fc1, b_fc1, w_fc2, b_fc2,
        num_heads=num_heads)
    out_bf = jax.block_until_ready(out_bf)
    assert out_bf.dtype == jnp.bfloat16, out_bf.dtype
    rel = float(jnp.linalg.norm(out_bf.astype(jnp.float32) - ref) /
                jnp.linalg.norm(ref))
    assert rel < 0.08, rel

    print("KERNEL_OK")
</pallas_src>

<mosaic_0001>
module attributes {stable_mosaic.version = 11 : i64} {
  func.func @_self_attention_cell_kernel(%arg0: i32, %arg1: memref<1x8x64xf32, #tpu.memory_space<vmem>>, %arg2: memref<1x64xf32, #tpu.memory_space<vmem>>, %arg3: memref<1x64xf32, #tpu.memory_space<vmem>>, %arg4: memref<64x192xf32, #tpu.memory_space<vmem>>, %arg5: memref<1x192xf32, #tpu.memory_space<vmem>>, %arg6: memref<1x64xf32, #tpu.memory_space<vmem>>, %arg7: memref<1x64xf32, #tpu.memory_space<vmem>>, %arg8: memref<64x256xf32, #tpu.memory_space<vmem>>, %arg9: memref<1x256xf32, #tpu.memory_space<vmem>>, %arg10: memref<256x64xf32, #tpu.memory_space<vmem>>, %arg11: memref<1x64xf32, #tpu.memory_space<vmem>>, %arg12: memref<1x8x64xf32, #tpu.memory_space<vmem>>, %arg13: memref<8x64xf32, #tpu.memory_space<vmem>>) attributes {dimension_semantics = [#tpu.dimension_semantics<parallel>], iteration_bounds = array<i64: 2>, scalar_prefetch = 0 : i64, scratch_operands = 1 : i64, tpu.core_type = #tpu.core_type<tc>, window_params = [{transform_indices = @transform_0, window_bounds = array<i64: 1, 8, 64>}, {pipeline_mode = #tpu.pipeline_mode<synchronous>, transform_indices = @transform_1, window_bounds = array<i64: 1, 64>}, {pipeline_mode = #tpu.pipeline_mode<synchronous>, transform_indices = @transform_2, window_bounds = array<i64: 1, 64>}, {pipeline_mode = #tpu.pipeline_mode<synchronous>, transform_indices = @transform_3, window_bounds = array<i64: 64, 192>}, {pipeline_mode = #tpu.pipeline_mode<synchronous>, transform_indices = @transform_4, window_bounds = array<i64: 1, 192>}, {pipeline_mode = #tpu.pipeline_mode<synchronous>, transform_indices = @transform_5, window_bounds = array<i64: 1, 64>}, {pipeline_mode = #tpu.pipeline_mode<synchronous>, transform_indices = @transform_6, window_bounds = array<i64: 1, 64>}, {pipeline_mode = #tpu.pipeline_mode<synchronous>, transform_indices = @transform_7, window_bounds = array<i64: 64, 256>}, {pipeline_mode = #tpu.pipeline_mode<synchronous>, transform_indices = @transform_8, window_bounds = array<i64: 1, 256>}, {pipeline_mode = #tpu.pipeline_mode<synchronous>, transform_indices = @transform_9, window_bounds = array<i64: 256, 64>}, {pipeline_mode = #tpu.pipeline_mode<synchronous>, transform_indices = @transform_10, window_bounds = array<i64: 1, 64>}, {transform_indices = @transform_11, window_bounds = array<i64: 1, 8, 64>}]} {
    %c0 = arith.constant 0 : index
    %c0_0 = arith.constant 0 : index
    %c0_1 = arith.constant 0 : index
    %0 = vector.load %arg1[%c0, %c0_0, %c0_1] : memref<1x8x64xf32, #tpu.memory_space<vmem>>, vector<1x8x64xf32>
    %1 = vector.shape_cast %0 : vector<1x8x64xf32> to vector<8x64xf32>
    %c0_2 = arith.constant 0 : index
    %c0_3 = arith.constant 0 : index
    %2 = vector.load %arg2[%c0_2, %c0_3] : memref<1x64xf32, #tpu.memory_space<vmem>>, vector<1x64xf32>
    %c0_4 = arith.constant 0 : index
    %c0_5 = arith.constant 0 : index
    %3 = vector.load %arg3[%c0_4, %c0_5] : memref<1x64xf32, #tpu.memory_space<vmem>>, vector<1x64xf32>
    %cst = arith.constant dense<0.000000e+00> : vector<8xf32>
    %4 = vector.multi_reduction <add>, %1, %cst [1] : vector<8x64xf32> to vector<8xf32>
    %5 = vector.shape_cast %4 : vector<8xf32> to vector<8x1xf32>
    %cst_6 = arith.constant 6.400000e+01 : f32
    %6 = vector.broadcast %cst_6 : f32 to vector<8x1xf32>
    %7 = arith.divf %5, %6 : vector<8x1xf32>
    %8 = vector.broadcast %7 : vector<8x1xf32> to vector<8x64xf32>
    %9 = arith.subf %1, %8 : vector<8x64xf32>
    %10 = arith.mulf %9, %9 : vector<8x64xf32>
    %cst_7 = arith.constant dense<0.000000e+00> : vector<8xf32>
    %11 = vector.multi_reduction <add>, %10, %cst_7 [1] : vector<8x64xf32> to vector<8xf32>
    %12 = vector.shape_cast %11 : vector<8xf32> to vector<8x1xf32>
    %cst_8 = arith.constant 6.400000e+01 : f32
    %13 = vector.broadcast %cst_8 : f32 to vector<8x1xf32>
    %14 = arith.divf %12, %13 : vector<8x1xf32>
    %cst_9 = arith.constant 9.99999974E-6 : f32
    %15 = vector.broadcast %cst_9 : f32 to vector<8x1xf32>
    %16 = arith.addf %14, %15 : vector<8x1xf32>
    %17 = math.rsqrt %16 : vector<8x1xf32>
    %18 = vector.broadcast %17 : vector<8x1xf32> to vector<8x64xf32>
    %19 = arith.mulf %9, %18 : vector<8x64xf32>
    %20 = vector.broadcast %2 : vector<1x64xf32> to vector<8x64xf32>
    %21 = arith.mulf %19, %20 : vector<8x64xf32>
    %22 = vector.broadcast %3 : vector<1x64xf32> to vector<8x64xf32>
    %23 = arith.addf %21, %22 : vector<8x64xf32>
    %c0_10 = arith.constant 0 : index
    %c0_11 = arith.constant 0 : index
    %24 = vector.load %arg4[%c0_10, %c0_11] : memref<64x192xf32, #tpu.memory_space<vmem>>, vector<64x192xf32>
    %cst_12 = arith.constant dense<0.000000e+00> : vector<8x192xf32>
    %25 = tpu.matmul %23, %24, %cst_12 {dimension_numbers = #tpu.dot_dimension_numbers<[1], [0], [0], [1], [0, 0, 1, 1], [], []>} : vector<8x64xf32>, vector<64x192xf32>, vector<8x192xf32> -> vector<8x192xf32>
    %c0_13 = arith.constant 0 : index
    %c0_14 = arith.constant 0 : index
    %26 = vector.load %arg5[%c0_13, %c0_14] : memref<1x192xf32, #tpu.memory_space<vmem>>, vector<1x192xf32>
    %27 = vector.broadcast %26 : vector<1x192xf32> to vector<8x192xf32>
    %28 = arith.addf %25, %27 : vector<8x192xf32>
    %29 = vector.extract_strided_slice %28 {offsets = [0, 0], sizes = [8, 8], strides = [1, 1]} : vector<8x192xf32> to vector<8x8xf32>
    %30 = vector.shape_cast %29 : vector<8x8xf32> to vector<1x8x8xf32>
    %31 = vector.extract_strided_slice %28 {offsets = [0, 64], sizes = [8, 8], strides = [1, 1]} : vector<8x192xf32> to vector<8x8xf32>
    %32 = vector.shape_cast %31 : vector<8x8xf32> to vector<1x8x8xf32>
    %33 = vector.extract_strided_slice %28 {offsets = [0, 128], sizes = [8, 8], strides = [1, 1]} : vector<8x192xf32> to vector<8x8xf32>
    %34 = vector.shape_cast %33 : vector<8x8xf32> to vector<1x8x8xf32>
    "tpu.trace_start"() <{level = 10 : i32, message = "bqd,bkd->bqk"}> : () -> ()
    %cst_15 = arith.constant dense<0.000000e+00> : vector<1x8x8xf32>
    %35 = tpu.matmul %30, %32, %cst_15 {dimension_numbers = #tpu.dot_dimension_numbers<[2], [2], [1], [1], [0, 0, 0, 1, 1, 1], [0], [0]>} : vector<1x8x8xf32>, vector<1x8x8xf32>, vector<1x8x8xf32> -> vector<1x8x8xf32>
    "tpu.trace_stop"() : () -> ()
    %cst_16 = arith.constant dense<0xFF800000> : vector<1x8xf32>
    %36 = vector.multi_reduction <maximumf>, %35, %cst_16 [2] : vector<1x8x8xf32> to vector<1x8xf32>
    %37 = vector.shape_cast %36 : vector<1x8xf32> to vector<1x8x1xf32>
    %38 = vector.broadcast %37 : vector<1x8x1xf32> to vector<1x8x8xf32>
    %39 = arith.subf %35, %38 : vector<1x8x8xf32>
    %40 = math.exp %39 : vector<1x8x8xf32>
    %cst_17 = arith.constant dense<0.000000e+00> : vector<1x8xf32>
    %41 = vector.multi_reduction <add>, %40, %cst_17 [2] : vector<1x8x8xf32> to vector<1x8xf32>
    %42 = vector.shape_cast %41 : vector<1x8xf32> to vector<1x8x1xf32>
    "tpu.trace_start"() <{level = 10 : i32, message = "bqk,bkd->bqd"}> : () -> ()
    %cst_18 = arith.constant dense<0.000000e+00> : vector<1x8x8xf32>
    %43 = tpu.matmul %40, %34, %cst_18 {dimension_numbers = #tpu.dot_dimension_numbers<[2], [1], [1], [2], [0, 0, 0, 1, 1, 2], [0], [0]>} : vector<1x8x8xf32>, vector<1x8x8xf32>, vector<1x8x8xf32> -> vector<1x8x8xf32>
    "tpu.trace_stop"() : () -> ()
    %44 = tpu.reciprocal %42 : vector<1x8x1xf32> -> vector<1x8x1xf32>
    %45 = vector.broadcast %44 : vector<1x8x1xf32> to vector<1x8x8xf32>
    %46 = arith.mulf %43, %45 : vector<1x8x8xf32>
    %47 = vector.shape_cast %46 : vector<1x8x8xf32> to vector<8x8xf32>
    %c0_19 = arith.constant 0 : index
    %c0_20 = arith.constant 0 : index
    %48 = vector.load %arg13[%c0_19, %c0_20] : memref<8x64xf32, #tpu.memory_space<vmem>>, vector<8x8xf32>
    tpu.vector_store %arg13[%c0_19, %c0_20], %47 {strides = array<i32>} : memref<8x64xf32, #tpu.memory_space<vmem>>, vector<8x8xf32>,
    %49 = vector.extract_strided_slice %28 {offsets = [0, 8], sizes = [8, 8], strides = [1, 1]} : vector<8x192xf32> to vector<8x8xf32>
    %50 = vector.shape_cast %49 : vector<8x8xf32> to vector<1x8x8xf32>
    %51 = vector.extract_strided_slice %28 {offsets = [0, 72], sizes = [8, 8], strides = [1, 1]} : vector<8x192xf32> to vector<8x8xf32>
    %52 = vector.shape_cast %51 : vector<8x8xf32> to vector<1x8x8xf32>
    %53 = vector.extract_strided_slice %28 {offsets = [0, 136], sizes = [8, 8], strides = [1, 1]} : vector<8x192xf32> to vector<8x8xf32>
    %54 = vector.shape_cast %53 : vector<8x8xf32> to vector<1x8x8xf32>
    "tpu.trace_start"() <{level = 10 : i32, message = "bqd,bkd->bqk"}> : () -> ()
    %cst_21 = arith.constant dense<0.000000e+00> : vector<1x8x8xf32>
    %55 = tpu.matmul %50, %52, %cst_21 {dimension_numbers = #tpu.dot_dimension_numbers<[2], [2], [1], [1], [0, 0, 0, 1, 1, 1], [0], [0]>} : vector<1x8x8xf32>, vector<1x8x8xf32>, vector<1x8x8xf32> -> vector<1x8x8xf32>
    "tpu.trace_stop"() : () -> ()
    %cst_22 = arith.constant dense<0xFF800000> : vector<1x8xf32>
    %56 = vector.multi_reduction <maximumf>, %55, %cst_22 [2] : vector<1x8x8xf32> to vector<1x8xf32>
    %57 = vector.shape_cast %56 : vector<1x8xf32> to vector<1x8x1xf32>
    %58 = vector.broadcast %57 : vector<1x8x1xf32> to vector<1x8x8xf32>
    %59 = arith.subf %55, %58 : vector<1x8x8xf32>
    %60 = math.exp %59 : vector<1x8x8xf32>
    %cst_23 = arith.constant dense<0.000000e+00> : vector<1x8xf32>
    %61 = vector.multi_reduction <add>, %60, %cst_23 [2] : vector<1x8x8xf32> to vector<1x8xf32>
    %62 = vector.shape_cast %61 : vector<1x8xf32> to vector<1x8x1xf32>
    "tpu.trace_start"() <{level = 10 : i32, message = "bqk,bkd->bqd"}> : () -> ()
    %cst_24 = arith.constant dense<0.000000e+00> : vector<1x8x8xf32>
    %63 = tpu.matmul %60, %54, %cst_24 {dimension_numbers = #tpu.dot_dimension_numbers<[2], [1], [1], [2], [0, 0, 0, 1, 1, 2], [0], [0]>} : vector<1x8x8xf32>, vector<1x8x8xf32>, vector<1x8x8xf32> -> vector<1x8x8xf32>
    "tpu.trace_stop"() : () -> ()
    %64 = tpu.reciprocal %62 : vector<1x8x1xf32> -> vector<1x8x1xf32>
    %65 = vector.broadcast %64 : vector<1x8x1xf32> to vector<1x8x8xf32>
    %66 = arith.mulf %63, %65 : vector<1x8x8xf32>
    %67 = vector.shape_cast %66 : vector<1x8x8xf32> to vector<8x8xf32>
    %c0_25 = arith.constant 0 : index
    %c8 = arith.constant 8 : index
    %68 = vector.load %arg13[%c0_25, %c8] : memref<8x64xf32, #tpu.memory_space<vmem>>, vector<8x8xf32>
    tpu.vector_store %arg13[%c0_25, %c8], %67 {strides = array<i32>} : memref<8x64xf32, #tpu.memory_space<vmem>>, vector<8x8xf32>,
    %69 = vector.extract_strided_slice %28 {offsets = [0, 16], sizes = [8, 8], strides = [1, 1]} : vector<8x192xf32> to vector<8x8xf32>
    %70 = vector.shape_cast %69 : vector<8x8xf32> to vector<1x8x8xf32>
    %71 = vector.extract_strided_slice %28 {offsets = [0, 80], sizes = [8, 8], strides = [1, 1]} : vector<8x192xf32> to vector<8x8xf32>
    %72 = vector.shape_cast %71 : vector<8x8xf32> to vector<1x8x8xf32>
    %73 = vector.extract_strided_slice %28 {offsets = [0, 144], sizes = [8, 8], strides = [1, 1]} : vector<8x192xf32> to vector<8x8xf32>
    %74 = vector.shape_cast %73 : vector<8x8xf32> to vector<1x8x8xf32>
    "tpu.trace_start"() <{level = 10 : i32, message = "bqd,bkd->bqk"}> : () -> ()
    %cst_26 = arith.constant dense<0.000000e+00> : vector<1x8x8xf32>
    %75 = tpu.matmul %70, %72, %cst_26 {dimension_numbers = #tpu.dot_dimension_numbers<[2], [2], [1], [1], [0, 0, 0, 1, 1, 1], [0], [0]>} : vector<1x8x8xf32>, vector<1x8x8xf32>, vector<1x8x8xf32> -> vector<1x8x8xf32>
    "tpu.trace_stop"() : () -> ()
    %cst_27 = arith.constant dense<0xFF800000> : vector<1x8xf32>
    %76 = vector.multi_reduction <maximumf>, %75, %cst_27 [2] : vector<1x8x8xf32> to vector<1x8xf32>
    %77 = vector.shape_cast %76 : vector<1x8xf32> to vector<1x8x1xf32>
    %78 = vector.broadcast %77 : vector<1x8x1xf32> to vector<1x8x8xf32>
    %79 = arith.subf %75, %78 : vector<1x8x8xf32>
    %80 = math.exp %79 : vector<1x8x8xf32>
    %cst_28 = arith.constant dense<0.000000e+00> : vector<1x8xf32>
    %81 = vector.multi_reduction <add>, %80, %cst_28 [2] : vector<1x8x8xf32> to vector<1x8xf32>
    %82 = vector.shape_cast %81 : vector<1x8xf32> to vector<1x8x1xf32>
    "tpu.trace_start"() <{level = 10 : i32, message = "bqk,bkd->bqd"}> : () -> ()
    %cst_29 = arith.constant dense<0.000000e+00> : vector<1x8x8xf32>
    %83 = tpu.matmul %80, %74, %cst_29 {dimension_numbers = #tpu.dot_dimension_numbers<[2], [1], [1], [2], [0, 0, 0, 1, 1, 2], [0], [0]>} : vector<1x8x8xf32>, vector<1x8x8xf32>, vector<1x8x8xf32> -> vector<1x8x8xf32>
    "tpu.trace_stop"() : () -> ()
    %84 = tpu.reciprocal %82 : vector<1x8x1xf32> -> vector<1x8x1xf32>
    %85 = vector.broadcast %84 : vector<1x8x1xf32> to vector<1x8x8xf32>
    %86 = arith.mulf %83, %85 : vector<1x8x8xf32>
    %87 = vector.shape_cast %86 : vector<1x8x8xf32> to vector<8x8xf32>
    %c0_30 = arith.constant 0 : index
    %c16 = arith.constant 16 : index
    %88 = vector.load %arg13[%c0_30, %c16] : memref<8x64xf32, #tpu.memory_space<vmem>>, vector<8x8xf32>
    tpu.vector_store %arg13[%c0_30, %c16], %87 {strides = array<i32>} : memref<8x64xf32, #tpu.memory_space<vmem>>, vector<8x8xf32>,
    %89 = vector.extract_strided_slice %28 {offsets = [0, 24], sizes = [8, 8], strides = [1, 1]} : vector<8x192xf32> to vector<8x8xf32>
    %90 = vector.shape_cast %89 : vector<8x8xf32> to vector<1x8x8xf32>
    %91 = vector.extract_strided_slice %28 {offsets = [0, 88], sizes = [8, 8], strides = [1, 1]} : vector<8x192xf32> to vector<8x8xf32>
    %92 = vector.shape_cast %91 : vector<8x8xf32> to vector<1x8x8xf32>
    %93 = vector.extract_strided_slice %28 {offsets = [0, 152], sizes = [8, 8], strides = [1, 1]} : vector<8x192xf32> to vector<8x8xf32>
    %94 = vector.shape_cast %93 : vector<8x8xf32> to vector<1x8x8xf32>
    "tpu.trace_start"() <{level = 10 : i32, message = "bqd,bkd->bqk"}> : () -> ()
    %cst_31 = arith.constant dense<0.000000e+00> : vector<1x8x8xf32>
    %95 = tpu.matmul %90, %92, %cst_31 {dimension_numbers = #tpu.dot_dimension_numbers<[2], [2], [1], [1], [0, 0, 0, 1, 1, 1], [0], [0]>} : vector<1x8x8xf32>, vector<1x8x8xf32>, vector<1x8x8xf32> -> vector<1x8x8xf32>
    "tpu.trace_stop"() : () -> ()
    %cst_32 = arith.constant dense<0xFF800000> : vector<1x8xf32>
    %96 = vector.multi_reduction <maximumf>, %95, %cst_32 [2] : vector<1x8x8xf32> to vector<1x8xf32>
    %97 = vector.shape_cast %96 : vector<1x8xf32> to vector<1x8x1xf32>
    %98 = vector.broadcast %97 : vector<1x8x1xf32> to vector<1x8x8xf32>
    %99 = arith.subf %95, %98 : vector<1x8x8xf32>
    %100 = math.exp %99 : vector<1x8x8xf32>
    %cst_33 = arith.constant dense<0.000000e+00> : vector<1x8xf32>
    %101 = vector.multi_reduction <add>, %100, %cst_33 [2] : vector<1x8x8xf32> to vector<1x8xf32>
    %102 = vector.shape_cast %101 : vector<1x8xf32> to vector<1x8x1xf32>
    "tpu.trace_start"() <{level = 10 : i32, message = "bqk,bkd->bqd"}> : () -> ()
    %cst_34 = arith.constant dense<0.000000e+00> : vector<1x8x8xf32>
    %103 = tpu.matmul %100, %94, %cst_34 {dimension_numbers = #tpu.dot_dimension_numbers<[2], [1], [1], [2], [0, 0, 0, 1, 1, 2], [0], [0]>} : vector<1x8x8xf32>, vector<1x8x8xf32>, vector<1x8x8xf32> -> vector<1x8x8xf32>
    "tpu.trace_stop"() : () -> ()
    %104 = tpu.reciprocal %102 : vector<1x8x1xf32> -> vector<1x8x1xf32>
    %105 = vector.broadcast %104 : vector<1x8x1xf32> to vector<1x8x8xf32>
    %106 = arith.mulf %103, %105 : vector<1x8x8xf32>
    %107 = vector.shape_cast %106 : vector<1x8x8xf32> to vector<8x8xf32>
    %c0_35 = arith.constant 0 : index
    %c24 = arith.constant 24 : index
    %108 = vector.load %arg13[%c0_35, %c24] : memref<8x64xf32, #tpu.memory_space<vmem>>, vector<8x8xf32>
    tpu.vector_store %arg13[%c0_35, %c24], %107 {strides = array<i32>} : memref<8x64xf32, #tpu.memory_space<vmem>>, vector<8x8xf32>,
    %109 = vector.extract_strided_slice %28 {offsets = [0, 32], sizes = [8, 8], strides = [1, 1]} : vector<8x192xf32> to vector<8x8xf32>
    %110 = vector.shape_cast %109 : vector<8x8xf32> to vector<1x8x8xf32>
    %111 = vector.extract_strided_slice %28 {offsets = [0, 96], sizes = [8, 8], strides = [1, 1]} : vector<8x192xf32> to vector<8x8xf32>
    %112 = vector.shape_cast %111 : vector<8x8xf32> to vector<1x8x8xf32>
    %113 = vector.extract_strided_slice %28 {offsets = [0, 160], sizes = [8, 8], strides = [1, 1]} : vector<8x192xf32> to vector<8x8xf32>
    %114 = vector.shape_cast %113 : vector<8x8xf32> to vector<1x8x8xf32>
    "tpu.trace_start"() <{level = 10 : i32, message = "bqd,bkd->bqk"}> : () -> ()
    %cst_36 = arith.constant dense<0.000000e+00> : vector<1x8x8xf32>
    %115 = tpu.matmul %110, %112, %cst_36 {dimension_numbers = #tpu.dot_dimension_numbers<[2], [2], [1], [1], [0, 0, 0, 1, 1, 1], [0], [0]>} : vector<1x8x8xf32>, vector<1x8x8xf32>, vector<1x8x8xf32> -> vector<1x8x8xf32>
    "tpu.trace_stop"() : () -> ()
    %cst_37 = arith.constant dense<0xFF800000> : vector<1x8xf32>
    %116 = vector.multi_reduction <maximumf>, %115, %cst_37 [2] : vector<1x8x8xf32> to vector<1x8xf32>
    %117 = vector.shape_cast %116 : vector<1x8xf32> to vector<1x8x1xf32>
    %118 = vector.broadcast %117 : vector<1x8x1xf32> to vector<1x8x8xf32>
    %119 = arith.subf %115, %118 : vector<1x8x8xf32>
    %120 = math.exp %119 : vector<1x8x8xf32>
    %cst_38 = arith.constant dense<0.000000e+00> : vector<1x8xf32>
    %121 = vector.multi_reduction <add>, %120, %cst_38 [2] : vector<1x8x8xf32> to vector<1x8xf32>
    %122 = vector.shape_cast %121 : vector<1x8xf32> to vector<1x8x1xf32>
    "tpu.trace_start"() <{level = 10 : i32, message = "bqk,bkd->bqd"}> : () -> ()
    %cst_39 = arith.constant dense<0.000000e+00> : vector<1x8x8xf32>
    %123 = tpu.matmul %120, %114, %cst_39 {dimension_numbers = #tpu.dot_dimension_numbers<[2], [1], [1], [2], [0, 0, 0, 1, 1, 2], [0], [0]>} : vector<1x8x8xf32>, vector<1x8x8xf32>, vector<1x8x8xf32> -> vector<1x8x8xf32>
    "tpu.trace_stop"() : () -> ()
    %124 = tpu.reciprocal %122 : vector<1x8x1xf32> -> vector<1x8x1xf32>
    %125 = vector.broadcast %124 : vector<1x8x1xf32> to vector<1x8x8xf32>
    %126 = arith.mulf %123, %125 : vector<1x8x8xf32>
    %127 = vector.shape_cast %126 : vector<1x8x8xf32> to vector<8x8xf32>
    %c0_40 = arith.constant 0 : index
    %c32 = arith.constant 32 : index
    %128 = vector.load %arg13[%c0_40, %c32] : memref<8x64xf32, #tpu.memory_space<vmem>>, vector<8x8xf32>
    tpu.vector_store %arg13[%c0_40, %c32], %127 {strides = array<i32>} : memref<8x64xf32, #tpu.memory_space<vmem>>, vector<8x8xf32>,
    %129 = vector.extract_strided_slice %28 {offsets = [0, 40], sizes = [8, 8], strides = [1, 1]} : vector<8x192xf32> to vector<8x8xf32>
    %130 = vector.shape_cast %129 : vector<8x8xf32> to vector<1x8x8xf32>
    %131 = vector.extract_strided_slice %28 {offsets = [0, 104], sizes = [8, 8], strides = [1, 1]} : vector<8x192xf32> to vector<8x8xf32>
    %132 = vector.shape_cast %131 : vector<8x8xf32> to vector<1x8x8xf32>
    %133 = vector.extract_strided_slice %28 {offsets = [0, 168], sizes = [8, 8], strides = [1, 1]} : vector<8x192xf32> to vector<8x8xf32>
    %134 = vector.shape_cast %133 : vector<8x8xf32> to vector<1x8x8xf32>
    "tpu.trace_start"() <{level = 10 : i32, message = "bqd,bkd->bqk"}> : () -> ()
    %cst_41 = arith.constant dense<0.000000e+00> : vector<1x8x8xf32>
    %135 = tpu.matmul %130, %132, %cst_41 {dimension_numbers = #tpu.dot_dimension_numbers<[2], [2], [1], [1], [0, 0, 0, 1, 1, 1], [0], [0]>} : vector<1x8x8xf32>, vector<1x8x8xf32>, vector<1x8x8xf32> -> vector<1x8x8xf32>
    "tpu.trace_stop"() : () -> ()
    %cst_42 = arith.constant dense<0xFF800000> : vector<1x8xf32>
    %136 = vector.multi_reduction <maximumf>, %135, %cst_42 [2] : vector<1x8x8xf32> to vector<1x8xf32>
    %137 = vector.shape_cast %136 : vector<1x8xf32> to vector<1x8x1xf32>
    %138 = vector.broadcast %137 : vector<1x8x1xf32> to vector<1x8x8xf32>
    %139 = arith.subf %135, %138 : vector<1x8x8xf32>
    %140 = math.exp %139 : vector<1x8x8xf32>
    %cst_43 = arith.constant dense<0.000000e+00> : vector<1x8xf32>
    %141 = vector.multi_reduction <add>, %140, %cst_43 [2] : vector<1x8x8xf32> to vector<1x8xf32>
    %142 = vector.shape_cast %141 : vector<1x8xf32> to vector<1x8x1xf32>
    "tpu.trace_start"() <{level = 10 : i32, message = "bqk,bkd->bqd"}> : () -> ()
    %cst_44 = arith.constant dense<0.000000e+00> : vector<1x8x8xf32>
    %143 = tpu.matmul %140, %134, %cst_44 {dimension_numbers = #tpu.dot_dimension_numbers<[2], [1], [1], [2], [0, 0, 0, 1, 1, 2], [0], [0]>} : vector<1x8x8xf32>, vector<1x8x8xf32>, vector<1x8x8xf32> -> vector<1x8x8xf32>
    "tpu.trace_stop"() : () -> ()
    %144 = tpu.reciprocal %142 : vector<1x8x1xf32> -> vector<1x8x1xf32>
    %145 = vector.broadcast %144 : vector<1x8x1xf32> to vector<1x8x8xf32>
    %146 = arith.mulf %143, %145 : vector<1x8x8xf32>
    %147 = vector.shape_cast %146 : vector<1x8x8xf32> to vector<8x8xf32>
    %c0_45 = arith.constant 0 : index
    %c40 = arith.constant 40 : index
    %148 = vector.load %arg13[%c0_45, %c40] : memref<8x64xf32, #tpu.memory_space<vmem>>, vector<8x8xf32>
    tpu.vector_store %arg13[%c0_45, %c40], %147 {strides = array<i32>} : memref<8x64xf32, #tpu.memory_space<vmem>>, vector<8x8xf32>,
    %149 = vector.extract_strided_slice %28 {offsets = [0, 48], sizes = [8, 8], strides = [1, 1]} : vector<8x192xf32> to vector<8x8xf32>
    %150 = vector.shape_cast %149 : vector<8x8xf32> to vector<1x8x8xf32>
    %151 = vector.extract_strided_slice %28 {offsets = [0, 112], sizes = [8, 8], strides = [1, 1]} : vector<8x192xf32> to vector<8x8xf32>
    %152 = vector.shape_cast %151 : vector<8x8xf32> to vector<1x8x8xf32>
    %153 = vector.extract_strided_slice %28 {offsets = [0, 176], sizes = [8, 8], strides = [1, 1]} : vector<8x192xf32> to vector<8x8xf32>
    %154 = vector.shape_cast %153 : vector<8x8xf32> to vector<1x8x8xf32>
    "tpu.trace_start"() <{level = 10 : i32, message = "bqd,bkd->bqk"}> : () -> ()
    %cst_46 = arith.constant dense<0.000000e+00> : vector<1x8x8xf32>
    %155 = tpu.matmul %150, %152, %cst_46 {dimension_numbers = #tpu.dot_dimension_numbers<[2], [2], [1], [1], [0, 0, 0, 1, 1, 1], [0], [0]>} : vector<1x8x8xf32>, vector<1x8x8xf32>, vector<1x8x8xf32> -> vector<1x8x8xf32>
    "tpu.trace_stop"() : () -> ()
    %cst_47 = arith.constant dense<0xFF800000> : vector<1x8xf32>
    %156 = vector.multi_reduction <maximumf>, %155, %cst_47 [2] : vector<1x8x8xf32> to vector<1x8xf32>
    %157 = vector.shape_cast %156 : vector<1x8xf32> to vector<1x8x1xf32>
    %158 = vector.broadcast %157 : vector<1x8x1xf32> to vector<1x8x8xf32>
    %159 = arith.subf %155, %158 : vector<1x8x8xf32>
    %160 = math.exp %159 : vector<1x8x8xf32>
    %cst_48 = arith.constant dense<0.000000e+00> : vector<1x8xf32>
    %161 = vector.multi_reduction <add>, %160, %cst_48 [2] : vector<1x8x8xf32> to vector<1x8xf32>
    %162 = vector.shape_cast %161 : vector<1x8xf32> to vector<1x8x1xf32>
    "tpu.trace_start"() <{level = 10 : i32, message = "bqk,bkd->bqd"}> : () -> ()
    %cst_49 = arith.constant dense<0.000000e+00> : vector<1x8x8xf32>
    %163 = tpu.matmul %160, %154, %cst_49 {dimension_numbers = #tpu.dot_dimension_numbers<[2], [1], [1], [2], [0, 0, 0, 1, 1, 2], [0], [0]>} : vector<1x8x8xf32>, vector<1x8x8xf32>, vector<1x8x8xf32> -> vector<1x8x8xf32>
    "tpu.trace_stop"() : () -> ()
    %164 = tpu.reciprocal %162 : vector<1x8x1xf32> -> vector<1x8x1xf32>
    %165 = vector.broadcast %164 : vector<1x8x1xf32> to vector<1x8x8xf32>
    %166 = arith.mulf %163, %165 : vector<1x8x8xf32>
    %167 = vector.shape_cast %166 : vector<1x8x8xf32> to vector<8x8xf32>
    %c0_50 = arith.constant 0 : index
    %c48 = arith.constant 48 : index
    %168 = vector.load %arg13[%c0_50, %c48] : memref<8x64xf32, #tpu.memory_space<vmem>>, vector<8x8xf32>
    tpu.vector_store %arg13[%c0_50, %c48], %167 {strides = array<i32>} : memref<8x64xf32, #tpu.memory_space<vmem>>, vector<8x8xf32>,
    %169 = vector.extract_strided_slice %28 {offsets = [0, 56], sizes = [8, 8], strides = [1, 1]} : vector<8x192xf32> to vector<8x8xf32>
    %170 = vector.shape_cast %169 : vector<8x8xf32> to vector<1x8x8xf32>
    %171 = vector.extract_strided_slice %28 {offsets = [0, 120], sizes = [8, 8], strides = [1, 1]} : vector<8x192xf32> to vector<8x8xf32>
    %172 = vector.shape_cast %171 : vector<8x8xf32> to vector<1x8x8xf32>
    %173 = vector.extract_strided_slice %28 {offsets = [0, 184], sizes = [8, 8], strides = [1, 1]} : vector<8x192xf32> to vector<8x8xf32>
    %174 = vector.shape_cast %173 : vector<8x8xf32> to vector<1x8x8xf32>
    "tpu.trace_start"() <{level = 10 : i32, message = "bqd,bkd->bqk"}> : () -> ()
    %cst_51 = arith.constant dense<0.000000e+00> : vector<1x8x8xf32>
    %175 = tpu.matmul %170, %172, %cst_51 {dimension_numbers = #tpu.dot_dimension_numbers<[2], [2], [1], [1], [0, 0, 0, 1, 1, 1], [0], [0]>} : vector<1x8x8xf32>, vector<1x8x8xf32>, vector<1x8x8xf32> -> vector<1x8x8xf32>
    "tpu.trace_stop"() : () -> ()
    %cst_52 = arith.constant dense<0xFF800000> : vector<1x8xf32>
    %176 = vector.multi_reduction <maximumf>, %175, %cst_52 [2] : vector<1x8x8xf32> to vector<1x8xf32>
    %177 = vector.shape_cast %176 : vector<1x8xf32> to vector<1x8x1xf32>
    %178 = vector.broadcast %177 : vector<1x8x1xf32> to vector<1x8x8xf32>
    %179 = arith.subf %175, %178 : vector<1x8x8xf32>
    %180 = math.exp %179 : vector<1x8x8xf32>
    %cst_53 = arith.constant dense<0.000000e+00> : vector<1x8xf32>
    %181 = vector.multi_reduction <add>, %180, %cst_53 [2] : vector<1x8x8xf32> to vector<1x8xf32>
    %182 = vector.shape_cast %181 : vector<1x8xf32> to vector<1x8x1xf32>
    "tpu.trace_start"() <{level = 10 : i32, message = "bqk,bkd->bqd"}> : () -> ()
    %cst_54 = arith.constant dense<0.000000e+00> : vector<1x8x8xf32>
    %183 = tpu.matmul %180, %174, %cst_54 {dimension_numbers = #tpu.dot_dimension_numbers<[2], [1], [1], [2], [0, 0, 0, 1, 1, 2], [0], [0]>} : vector<1x8x8xf32>, vector<1x8x8xf32>, vector<1x8x8xf32> -> vector<1x8x8xf32>
    "tpu.trace_stop"() : () -> ()
    %184 = tpu.reciprocal %182 : vector<1x8x1xf32> -> vector<1x8x1xf32>
    %185 = vector.broadcast %184 : vector<1x8x1xf32> to vector<1x8x8xf32>
    %186 = arith.mulf %183, %185 : vector<1x8x8xf32>
    %187 = vector.shape_cast %186 : vector<1x8x8xf32> to vector<8x8xf32>
    %c0_55 = arith.constant 0 : index
    %c56 = arith.constant 56 : index
    %188 = vector.load %arg13[%c0_55, %c56] : memref<8x64xf32, #tpu.memory_space<vmem>>, vector<8x8xf32>
    tpu.vector_store %arg13[%c0_55, %c56], %187 {strides = array<i32>} : memref<8x64xf32, #tpu.memory_space<vmem>>, vector<8x8xf32>,
    %c0_56 = arith.constant 0 : index
    %c0_57 = arith.constant 0 : index
    %189 = vector.load %arg13[%c0_56, %c0_57] : memref<8x64xf32, #tpu.memory_space<vmem>>, vector<8x64xf32>
    %c0_58 = arith.constant 0 : index
    %c0_59 = arith.constant 0 : index
    %190 = vector.load %arg6[%c0_58, %c0_59] : memref<1x64xf32, #tpu.memory_space<vmem>>, vector<1x64xf32>
    %c0_60 = arith.constant 0 : index
    %c0_61 = arith.constant 0 : index
    %191 = vector.load %arg7[%c0_60, %c0_61] : memref<1x64xf32, #tpu.memory_space<vmem>>, vector<1x64xf32>
    %cst_62 = arith.constant dense<0.000000e+00> : vector<8xf32>
    %192 = vector.multi_reduction <add>, %189, %cst_62 [1] : vector<8x64xf32> to vector<8xf32>
    %193 = vector.shape_cast %192 : vector<8xf32> to vector<8x1xf32>
    %cst_63 = arith.constant 6.400000e+01 : f32
    %194 = vector.broadcast %cst_63 : f32 to vector<8x1xf32>
    %195 = arith.divf %193, %194 : vector<8x1xf32>
    %196 = vector.broadcast %195 : vector<8x1xf32> to vector<8x64xf32>
    %197 = arith.subf %189, %196 : vector<8x64xf32>
    %198 = arith.mulf %197, %197 : vector<8x64xf32>
    %cst_64 = arith.constant dense<0.000000e+00> : vector<8xf32>
    %199 = vector.multi_reduction <add>, %198, %cst_64 [1] : vector<8x64xf32> to vector<8xf32>
    %200 = vector.shape_cast %199 : vector<8xf32> to vector<8x1xf32>
    %cst_65 = arith.constant 6.400000e+01 : f32
    %201 = vector.broadcast %cst_65 : f32 to vector<8x1xf32>
    %202 = arith.divf %200, %201 : vector<8x1xf32>
    %cst_66 = arith.constant 9.99999974E-6 : f32
    %203 = vector.broadcast %cst_66 : f32 to vector<8x1xf32>
    %204 = arith.addf %202, %203 : vector<8x1xf32>
    %205 = math.rsqrt %204 : vector<8x1xf32>
    %206 = vector.broadcast %205 : vector<8x1xf32> to vector<8x64xf32>
    %207 = arith.mulf %197, %206 : vector<8x64xf32>
    %208 = vector.broadcast %190 : vector<1x64xf32> to vector<8x64xf32>
    %209 = arith.mulf %207, %208 : vector<8x64xf32>
    %210 = vector.broadcast %191 : vector<1x64xf32> to vector<8x64xf32>
    %211 = arith.addf %209, %210 : vector<8x64xf32>
    %c0_67 = arith.constant 0 : index
    %c0_68 = arith.constant 0 : index
    %212 = vector.load %arg8[%c0_67, %c0_68] : memref<64x256xf32, #tpu.memory_space<vmem>>, vector<64x256xf32>
    %cst_69 = arith.constant dense<0.000000e+00> : vector<8x256xf32>
    %213 = tpu.matmul %211, %212, %cst_69 {dimension_numbers = #tpu.dot_dimension_numbers<[1], [0], [0], [1], [0, 0, 1, 1], [], []>} : vector<8x64xf32>, vector<64x256xf32>, vector<8x256xf32> -> vector<8x256xf32>
    %c0_70 = arith.constant 0 : index
    %c0_71 = arith.constant 0 : index
    %214 = vector.load %arg9[%c0_70, %c0_71] : memref<1x256xf32, #tpu.memory_space<vmem>>, vector<1x256xf32>
    %215 = vector.broadcast %214 : vector<1x256xf32> to vector<8x256xf32>
    %216 = arith.addf %213, %215 : vector<8x256xf32>
    %cst_72 = arith.constant 0.000000e+00 : f32
    %217 = vector.broadcast %cst_72 : f32 to vector<8x256xf32>
    %218 = arith.maximumf %216, %217 : vector<8x256xf32>
    %c0_73 = arith.constant 0 : index
    %c0_74 = arith.constant 0 : index
    %219 = vector.load %arg10[%c0_73, %c0_74] : memref<256x64xf32, #tpu.memory_space<vmem>>, vector<256x64xf32>
    %cst_75 = arith.constant dense<0.000000e+00> : vector<8x64xf32>
    %220 = tpu.matmul %218, %219, %cst_75 {dimension_numbers = #tpu.dot_dimension_numbers<[1], [0], [0], [1], [0, 0, 1, 1], [], []>} : vector<8x256xf32>, vector<256x64xf32>, vector<8x64xf32> -> vector<8x64xf32>
    %c0_76 = arith.constant 0 : index
    %c0_77 = arith.constant 0 : index
    %221 = vector.load %arg11[%c0_76, %c0_77] : memref<1x64xf32, #tpu.memory_space<vmem>>, vector<1x64xf32>
    %222 = vector.broadcast %221 : vector<1x64xf32> to vector<8x64xf32>
    %223 = arith.addf %220, %222 : vector<8x64xf32>
    %224 = arith.addf %189, %223 : vector<8x64xf32>
    %225 = vector.shape_cast %224 : vector<8x64xf32> to vector<1x8x64xf32>
    %c0_78 = arith.constant 0 : index
    %c0_79 = arith.constant 0 : index
    %c0_80 = arith.constant 0 : index
    %226 = vector.load %arg12[%c0_78, %c0_79, %c0_80] : memref<1x8x64xf32, #tpu.memory_space<vmem>>, vector<1x8x64xf32>
    tpu.vector_store %arg12[%c0_78, %c0_79, %c0_80], %225 {strides = array<i32>} : memref<1x8x64xf32, #tpu.memory_space<vmem>>, vector<1x8x64xf32>,
    return
  }
  func.func @transform_0(%arg0: i32) -> (i32, i32, i32) {
    %c0_i32 = arith.constant 0 : i32
    %c0_i32_0 = arith.constant 0 : i32
    %c0_i32_1 = arith.constant 0 : i32
    return %arg0, %c0_i32, %c0_i32_0 : i32, i32, i32
  }
  func.func @transform_1(%arg0: i32) -> (i32, i32) {
    %c0_i32 = arith.constant 0 : i32
    %c0_i32_0 = arith.constant 0 : i32
    %c0_i32_1 = arith.constant 0 : i32
    return %c0_i32, %c0_i32_0 : i32, i32
  }
  func.func @transform_2(%arg0: i32) -> (i32, i32) {
    %c0_i32 = arith.constant 0 : i32
    %c0_i32_0 = arith.constant 0 : i32
    %c0_i32_1 = arith.constant 0 : i32
    return %c0_i32, %c0_i32_0 : i32, i32
  }
  func.func @transform_3(%arg0: i32) -> (i32, i32) {
    %c0_i32 = arith.constant 0 : i32
    %c0_i32_0 = arith.constant 0 : i32
    %c0_i32_1 = arith.constant 0 : i32
    return %c0_i32, %c0_i32_0 : i32, i32
  }
  func.func @transform_4(%arg0: i32) -> (i32, i32) {
    %c0_i32 = arith.constant 0 : i32
    %c0_i32_0 = arith.constant 0 : i32
    %c0_i32_1 = arith.constant 0 : i32
    return %c0_i32, %c0_i32_0 : i32, i32
  }
  func.func @transform_5(%arg0: i32) -> (i32, i32) {
    %c0_i32 = arith.constant 0 : i32
    %c0_i32_0 = arith.constant 0 : i32
    %c0_i32_1 = arith.constant 0 : i32
    return %c0_i32, %c0_i32_0 : i32, i32
  }
  func.func @transform_6(%arg0: i32) -> (i32, i32) {
    %c0_i32 = arith.constant 0 : i32
    %c0_i32_0 = arith.constant 0 : i32
    %c0_i32_1 = arith.constant 0 : i32
    return %c0_i32, %c0_i32_0 : i32, i32
  }
  func.func @transform_7(%arg0: i32) -> (i32, i32) {
    %c0_i32 = arith.constant 0 : i32
    %c0_i32_0 = arith.constant 0 : i32
    %c0_i32_1 = arith.constant 0 : i32
    return %c0_i32, %c0_i32_0 : i32, i32
  }
  func.func @transform_8(%arg0: i32) -> (i32, i32) {
    %c0_i32 = arith.constant 0 : i32
    %c0_i32_0 = arith.constant 0 : i32
    %c0_i32_1 = arith.constant 0 : i32
    return %c0_i32, %c0_i32_0 : i32, i32
  }
  func.func @transform_9(%arg0: i32) -> (i32, i32) {
    %c0_i32 = arith.constant 0 : i32
    %c0_i32_0 = arith.constant 0 : i32
    %c0_i32_1 = arith.constant 0 : i32
    return %c0_i32, %c0_i32_0 : i32, i32
  }
  func.func @transform_10(%arg0: i32) -> (i32, i32) {
    %c0_i32 = arith.constant 0 : i32
    %c0_i32_0 = arith.constant 0 : i32
    %c0_i32_1 = arith.constant 0 : i32
    return %c0_i32, %c0_i32_0 : i32, i32
  }
  func.func @transform_11(%arg0: i32) -> (i32, i32, i32) {
    %c0_i32 = arith.constant 0 : i32
    %c0_i32_0 = arith.constant 0 : i32
    %c0_i32_1 = arith.constant 0 : i32
    return %arg0, %c0_i32, %c0_i32_0 : i32, i32, i32
  }
}

</mosaic_0001>

<bundles_post_ra>
// kernel: tpu_custom_call.1
= control target key start
LH: loop header
LB: loop body
LE: loop exit
PB: predicated region body
PF: predicated region fallthrough
CT: control target
= control target key end

     0   :  { %s2095_s0 = inlined_call_operand.vmem [shape: f32[2,8,64], index: 0, kind: input, shape index: {}]   ;;  %s2096_s1 = inlined_call_operand.vmem [shape: f32[1,64], index: 1, kind: input, shape index: {}]   ;;  %s2097_s2 = inlined_call_operand.vmem [shape: f32[1,64], index: 2, kind: input, shape index: {}]   ;;  %s2098_s3 = inlined_call_operand.vmem [shape: f32[64,192], index: 3, kind: input, shape index: {}]   ;;  %s2099_s4 = inlined_call_operand.vmem [shape: f32[1,192], index: 4, kind: input, shape index: {}]   ;;  %s2100_s5 = inlined_call_operand.vmem [shape: f32[1,64], index: 5, kind: input, shape index: {}]   ;;  %s2101_s6 = inlined_call_operand.vmem [shape: f32[1,64], index: 6, kind: input, shape index: {}]   ;;  %s2102_s7 = inlined_call_operand.vmem [shape: f32[64,256], index: 7, kind: input, shape index: {}]   ;;  %s2103_s8 = inlined_call_operand.vmem [shape: f32[1,256], index: 8, kind: input, shape index: {}]   ;;  %s2104_s9 = inlined_call_operand.vmem [shape: f32[256,64], index: 9, kind: input, shape index: {}]   ;;  %s2105_s10 = inlined_call_operand.vmem [shape: f32[1,64], index: 10, kind: input, shape index: {}]   ;;  %s2106_s11 = inlined_call_operand.hbm [shape: f32[2,8,64], index: 11, kind: output, shape index: {}]  }
   0x1   :  { %2111 = sst [smem:[#allocation6_spill]] %s2095_s0 }
   0x2   :  { %16 = vsyncpa [#allocation4], 0 }
   0x3   :  { %18 = vsyncpa [#allocation4 + $0x1], 0  ;;  %s1682_s17 = smov 0   ;;  %s1684_s18 = smov 0  }
   0x4   :  { %s1686_s19 = smov 0   ;;  %s1688_s20 = smov 0  }
   0x5 LB: > { %s1703_s21 = sadd.s32 4294967295, %s1604_s20   ;;  %s1406_s22 = sadd.s32 4294967294, %s1604_s20   ;;  %s1604_s20 = sphi %s1688_s20, %s2122_s20   ;;  %s1600_s19 = sphi %s1686_s19, %s2121_s19   ;;  %s1596_s18 = sphi %s1684_s18, %s2120_s18   ;;  %s1592_s17 = sphi %s1682_s17, %s2119_s17  }
   0x6   : > { %s1707_s23 = sadd.s32 1, %s1604_s20   ;;  %s267_s24 = sadd.s32 1, %s1600_s19 }
   0x7   : > { %s264_s25 = ssub.s32 %s1604_s20, %s1707_s23  ;;  %p277_p0 = scmp.ne.s32.totalorder %s1600_s19, %s1596_s18 }
   0x8   : > { %p265_p1 = scmp.eq.s32.totalorder %s264_s25, 0  ;;  %p278_p2 = scmp.eq.s32.totalorder %s1703_s21, 1 }
   0x9   : > { %p283_p3 = scmp.ne.s32.totalorder %s1596_s18, %s1592_s17  ;;  %p284_p4 = scmp.eq.s32.totalorder %s1406_s22, 1 }
   0xa   : > { %s1718_s26 = scalar_select %p265_p1, %s1600_s19, %s267_s24  }
   0xb   : > { %p1720_p5 = por %p278_p2, %p277_p0  ;;  %p1724_p6 = por %p284_p4, %p283_p3 }
   0xc   : > { %p1409_p7 = scmp.ge.s32.totalorder %s1604_s20, 1  ;;  %p339_p8 = scmp.lt.s32.totalorder %s1604_s20, 3 }
   0xe   : > { %p340_p9 = pnand %p1409_p7, %p339_p8 }
   0xf   : > { %p378_p10 = scmp.lt.s32.totalorder (!%p340_p9), %s1703_s21, 1  ;;  %s2114_s0 = sld [smem:[#allocation6_spill]] (!%p340_p9) }
  0x10   : > { %343 = sbr.rel (%p340_p9) target bundleno = 1962 (0x7aa), region = 64  ;;  %s2107_s13 = smov (!%p340_p9), 48  }
  0x11   : > { %s1609_s15 = smov (!%p340_p9), 64   ;;  %s2109_s16 = smov (!%p340_p9), 32  }
  0x12   : > { %s1611_s22 = smov (!%p340_p9), 120   ;;  %s1612_s24 = smov (!%p340_p9), 16  }
  0x13   : > { %s1613_s25 = smov (!%p340_p9), 112   ;;  %s1616_s12 = smov (!%p340_p9), 72  }
  0x15   : > { %s379_s29 = scalar_select %p378_p10, %s1703_s21, 1  ;;  %vm385_vm0 = vcmask 523264   ;;  %v1606_v2 = vmov 64.0   ;;  %v437_v14 = vld [vmem:[%s2098_s3 + $0x70] sm:$0xff]  ;;  %v438_v15 = vld [vmem:[%s2098_s3 + $0x78] sm:$0xff]  ;;  %v435_v16 = vld [vmem:[%s2098_s3 + $0x60] sm:$0xff] }
  0x16   : > { %1504 = vrcp.f32 %v1606_v2  ;;  %456 = vmatpush.msra.mxu0 %v437_v14  ;;  %476 = vmatpush.msra.mxu1 %v438_v15  ;;  %v436_v17 = vld [vmem:[%s2098_s3 + $0x68] sm:$0xff]  ;;  %v433_v18 = vld [vmem:[%s2098_s3 + $0x50] sm:$0xff]  ;;  %v434_v19 = vld [vmem:[%s2098_s3 + $0x58] sm:$0xff]  ;;  %vm491_vm5 = vcmask 64512  }
  0x17   : > { %s1411_s30 = sshll.u32 %s379_s29, 3  ;;  %v431_v20 = vld [vmem:[%s2098_s3 + $0x40] sm:$0xff]  ;;  %v432_v21 = vld [vmem:[%s2098_s3 + $0x48] sm:$0xff]  ;;  %v429_v22 = vld [vmem:[%s2098_s3 + $0x30] sm:$0xff]  ;;  %s1614_s29 = smov 88  }
  0x18   : > { %s381_s14 = scalar_lea.vmem %s2114_s0, %s1411_s30  ;;  %457 = vmatpush.msra.mxu0 %v435_v16  ;;  %477 = vmatpush.msra.mxu1 %v436_v17  ;;  %v430_v23 = vld [vmem:[%s2098_s3 + $0x38] sm:$0xff]  ;;  %v427_v24 = vld [vmem:[%s2098_s3 + $0x20] sm:$0xff]  ;;  %v428_v25 = vld [vmem:[%s2098_s3 + $0x28] sm:$0xff]  ;;  %s2110_s30 = smov 40  }
  0x19   : > { %v382_v0 = vld [vmem:[%s381_s14] sm:$0xff]  ;;  %v425_v26 = vld [vmem:[%s2098_s3 + $0x10] sm:$0xff]  ;;  %v426_v27 = vld [vmem:[%s2098_s3 + $0x18] sm:$0xff]  ;;  %s2108_s14 = smov 56  }
  0x1a   : > { %v386_v1 = vsel %vm385_vm0, %v382_v0, 0.0  ;;  %458 = vmatpush.msra.mxu0 %v433_v18  ;;  %478 = vmatpush.msra.mxu1 %v434_v19  ;;  %v423_v28 = vld [vmem:[%s2098_s3] sm:$0xff]  ;;  %v424_v29 = vld [vmem:[%s2098_s3 + $0x8] sm:$0xff] }
  0x1b   : > { %387 = vadd.xlane.f32.xlu0 %v386_v1  ;;  %v1499_v39 = vld [vmem:[%s2096_s1] ss:$0 sm:$0xff] }
  0x1c   : > { %v1505_v3 = vpop.eup %1504  ;;  %459 = vmatpush.msra.mxu0 %v431_v20  ;;  %479 = vmatpush.msra.mxu1 %v432_v21  ;;  %v1500_v42 = vld [vmem:[%s2097_s2] ss:$0 sm:$0xff] }
  0x1d   : > { %v390_v4 = vmul.f32 64.0, %v1505_v3  ;;  %vm394_vm1 = vweird.f32 %v1505_v3  ;;  %v439_v45 = vld [vmem:[%s2099_s4] sm:$0x3] }
  0x1e   : > { %460 = vmatpush.msra.mxu0 %v429_v22  ;;  %480 = vmatpush.msra.mxu1 %v430_v23  ;;  %v441_v46 = vperm.slane %v439_v45, 0  ;;  %v442_v47 = vperm.slane %v439_v45, 1 }
  0x1f   : > { %v391_v5 = vsub.f32 1.0, %v390_v4 }
  0x20   : > { %461 = vmatpush.msra.mxu0 %v427_v24  ;;  %481 = vmatpush.msra.mxu1 %v428_v25 }
  0x21   : > { %v392_v6 = vmul.f32 %v1505_v3, %v391_v5 }
  0x22   : > { %462 = vmatpush.msra.mxu0 %v425_v26  ;;  %482 = vmatpush.msra.mxu1 %v426_v27 }
  0x23   : > { %v393_v7 = vadd.f32 %v1505_v3, %v392_v6 }
  0x24   : > { %463 = vmatpush.msra.mxu0 %v423_v28  ;;  %483 = vmatpush.msra.mxu1 %v424_v29 }
  0x25   : > { %v1736_v8 = vsel %vm394_vm1, %v1505_v3, %v393_v7 }
  0x8e   : > { %v388_v9 = vpop.xlane.xlu0 %387 }
  0x8f   : > { %v396_v10 = vmul.f32 %v1736_v8, %v388_v9 }
  0x91   : > { %v397_v11 = vsub.f32 %v382_v0, %v396_v10 }
  0x93   : > { %v398_v12 = vmul.f32 %v397_v11, %v397_v11 }
  0x95   : > { %v399_v13 = vsel %vm385_vm0, %v398_v12, 0.0 }
  0x96   : > { %400 = vadd.xlane.f32.xlu0 %v399_v13 }
 0x109   : > { %v401_v30 = vpop.xlane.xlu0 %400 }
 0x10a   : > { %v402_v31 = vmul.f32 %v401_v30, %v1736_v8 }
 0x10c   : > { %v403_v32 = vadd.f32 1e-05, %v402_v31 }
 0x10e   : > { %1506 = vrsqrt.f32 %v403_v32  ;;  %vm410_vm3 = vweird.f32 %v403_v32 }
 0x114   : > { %v1507_v33 = vpop.eup %1506 }
 0x115   : > { %v405_v34 = vmul.f32 %v1507_v33, %v403_v32  ;;  %vm411_vm2 = vweird.f32 %v1507_v33 }
 0x116   : > { %vm412_vm4 = vmor %vm410_vm3, %vm411_vm2 }
 0x117   : > { %v406_v35 = vmul.f32 %v1507_v33, %v405_v34 }
 0x119   : > { %v407_v36 = vmul.f32 0.5, %v406_v35 }
 0x11b   : > { %v408_v37 = vsub.f32 1.5, %v407_v36 }
 0x11d   : > { %v409_v38 = vmul.f32 %v1507_v33, %v408_v37 }
 0x11f   : > { %v413_v40 = vsel %vm412_vm4, %v1507_v33, %v409_v38 }
 0x120   : > { %v414_v41 = vmul.f32 %v413_v40, %v397_v11 }
 0x122   : > { %v418_v43 = vmul.f32 %v1499_v39, %v414_v41 }
 0x124   : > { %v422_v44 = vadd.f32 %v1500_v42, %v418_v43 }
 0x126   : > { %1412 = vmatmul.msk.f32.vlgmr.msra.gmra.mxu0 %vm385_vm0, %v422_v44  ;;  %1413 = vmatmul.msk.f32.vlgmr.msra.gmra.mxu1 %vm385_vm0, %v422_v44 }
 0x1a3   : > { %v465_v48 = vpop.f32.mrf.mxu0  ;;  %v485_v49 = vpop.f32.mrf.mxu1 }
 0x1a4   : > { %v466_v50 = vadd.f32 %v465_v48, %v441_v46  ;;  %v1800_v51 = vadd.f32 %v485_v49, %v442_v47 }
 0x1a6   : > { %543 = vmatpush.msra.mxu3 %v1800_v51  ;;  %651 = vrot.lane.b32.xlu0 %v466_v50, %s2107_s13  ;;  %s1618_s13 = smov 96  }
 0x1a7   : > { %566 = vrot.lane.b32.xlu2 %v466_v50, %s2108_s14  ;;  %489 = vrot.lane.b32.xlu1 %v466_v50, %s1609_s15  ;;  %s1617_s15 = smov 104   ;;  %s1619_s14 = smov 80  }
 0x1ae   : > { %819 = vrot.lane.b32.xlu0 %v466_v50, %s2109_s16  ;;  %s1620_s16 = smov 8  }
 0x1af   : > { %564 = vrot.lane.b32.xlu2 %v466_v50, %s1611_s22 }
 0x1b6   : > { %987 = vrot.lane.b32.xlu0 %v466_v50, %s1612_s24 }
 0x1b7   : > { %649 = vrot.lane.b32.xlu2 %v466_v50, %s1613_s25 }
 0x1be   : > { %901 = vrot.lane.b32.xlu0 %v466_v50, %s1614_s29 }
 0x1bf   : > { %735 = vrot.lane.b32.xlu2 %v466_v50, %s2110_s30  ;;  %s1621_s30 = smov 24  }
 0x1c6   : > { %1069 = vrot.lane.b32.xlu0 %v466_v50, %s1616_s12 }
 0x1c7   : > { %733 = vrot.lane.b32.xlu2 %v466_v50, %s1617_s15 }
 0x1cf   : > { %817 = vrot.lane.b32.xlu2 %v466_v50, %s1618_s13 }
 0x1d7   : > { %985 = vrot.lane.b32.xlu2 %v466_v50, %s1619_s14 }
 0x1df   : > { %1071 = vrot.lane.b32.xlu2 %v466_v50, %s1620_s16 }
 0x201   : > { %v567_v52 = vpop.permute.xlu2 %566 }
 0x202   : > { %1417 = vmatpush.xpose.msk.msrb.mxu3 %vm491_vm5, %v567_v52 }
 0x209   : > { %v565_v56 = vpop.permute.xlu2 %564 }
 0x211   : > { %v650_v57 = vpop.permute.xlu2 %649 }
 0x218   : > { %v652_v59 = vpop.permute.xlu0 %651 }
 0x219   : > { %v490_v53 = vpop.permute.xlu1 %489  ;;  %v736_v58 = vpop.permute.xlu2 %735 }
 0x21a   : > { %1414 = vmatpush.xpose.msk.msra.mxu2 %vm491_vm5, %v490_v53 }
 0x21d   : > { %1415 = vmatmul.msk.f32.vlgmr.msra.gmra.mxu2 %vm491_vm5, %v466_v50 }
 0x220   : > { %v820_v0 = vpop.permute.xlu0 %819 }
 0x221   : > { %v734_v60 = vpop.permute.xlu2 %733 }
 0x228   : > { %v988_v3 = vpop.permute.xlu0 %987 }
 0x229   : > { %v818_v1 = vpop.permute.xlu2 %817 }
 0x230   : > { %v902_v6 = vpop.permute.xlu0 %901 }
 0x231   : > { %v986_v4 = vpop.permute.xlu2 %985 }
 0x238   : > { %v1070_v10 = vpop.permute.xlu0 %1069 }
 0x239   : > { %v1072_v7 = vpop.permute.xlu2 %1071 }
 0x2a0   : > { %v513_v54 = vpop.f32.mrf.mxu2 }
 0x2a1   : > { %v516_v55 = vsel %vm491_vm5, %v513_v54, -inf }
 0x2a2   : > { %517 = vmax.xlane.f32.xlu1 %v516_v55 }
 0x2bb   : > { %903 = vrot.lane.b32.xlu1 %v466_v50, %s1621_s30 }
 0x2c3   : > { %602 = vrot.lane.b32.xlu1 %v1800_v51, %s1611_s22  ;;  %s2118_s22 = smov 48  }
 0x315   : > { %v518_v61 = vpop.xlane.xlu1 %517 }
 0x316   : > { %v519_v62 = vsub.f32 %v513_v54, %v518_v61 }
 0x318   : > { %v520_v63 = vmul.f32 1.442695, %v519_v62 }
 0x31a   : > { %1508 = vpow2.f32 %v520_v63 }
 0x320   : > { %v1823_v2 = vpop.eup %1508 }
 0x321   : > { %1416 = vmatmul.msk.f32.vlgmr.msra.gmra.mxu3 %vm491_vm5, %v1823_v2  ;;  %v522_v40 = vsel %vm491_vm5, %v1823_v2, 0.0 }
 0x322   : > { %1420 = vmatpush.xpose.msk.msra.mxu3 %vm491_vm5, %v652_v59 }
 0x329   : > { %1418 = vmatmul.msk.f32.vlgmr.msrb.gmra.mxu3 %vm491_vm5, %v565_v56 }
 0x32a   : > { %1423 = vmatpush.xpose.msk.msrb.mxu3 %vm491_vm5, %v736_v58 }
 0x32d   : > { %v904_v5 = vpop.permute.xlu1 %903 }
 0x32e   : > { %1429 = vmatpush.xpose.msk.msrb.mxu0 %vm491_vm5, %v904_v5 }
 0x331   : > { %1421 = vmatmul.msk.f32.vlgmr.msra.gmra.mxu3 %vm491_vm5, %v650_v57  ;;  %1430 = vmatmul.msk.f32.vlgmr.msrb.gmra.mxu0 %vm491_vm5, %v902_v6 }
 0x332   : > { %1435 = vmatpush.xpose.msk.msra.mxu0 %vm491_vm5, %v1072_v7  ;;  %1426 = vmatpush.xpose.msk.msra.mxu3 %vm491_vm5, %v820_v0 }
 0x335   : > { %v603_v9 = vpop.permute.xlu1 %602 }
 0x336   : > { %623 = vmatpush.msrb.mxu2 %v603_v9 }
 0x339   : > { %1424 = vmatmul.msk.f32.vlgmr.msrb.gmra.mxu3 %vm491_vm5, %v734_v60  ;;  %1436 = vmatmul.msk.f32.vlgmr.msra.gmra.mxu0 %vm491_vm5, %v1070_v10 }
 0x33a   : > { %1432 = vmatpush.xpose.msk.msrb.mxu3 %vm491_vm5, %v988_v3 }
 0x341   : > { %1427 = vmatmul.msk.f32.vlgmr.msra.gmra.mxu3 %vm491_vm5, %v818_v1 }
 0x349   : > { %1433 = vmatmul.msk.f32.vlgmr.msrb.gmra.mxu3 %vm491_vm5, %v986_v4 }
 0x3a4   : > { %v1840_v11 = vpop.f32.mrf.mxu3 }
 0x3ac   : > { %v589_v12 = vpop.f32.mrf.mxu3 }
 0x3ad   : > { %v592_v13 = vsel %vm491_vm5, %v589_v12, -inf }
 0x3ae   : > { %593 = vmax.xlane.f32.xlu2 %v592_v13  ;;  %v926_v18 = vpop.f32.mrf.mxu0 }
 0x3af   : > { %v929_v21 = vsel %vm491_vm5, %v926_v18, -inf }
 0x3b4   : > { %v674_v14 = vpop.f32.mrf.mxu3 }
 0x3b5   : > { %v677_v15 = vsel %vm491_vm5, %v674_v14, -inf }
 0x3b6   : > { %678 = vmax.xlane.f32.xlu0 %v677_v15  ;;  %v1858_v24 = vpop.f32.mrf.mxu0 }
 0x3b7   : > { %v1097_v25 = vsel %vm491_vm5, %v1858_v24, -inf }
 0x3bc   : > { %v758_v16 = vpop.f32.mrf.mxu3 }
 0x3bd   : > { %v761_v17 = vsel %vm491_vm5, %v758_v16, -inf }
 0x3be   : > { %762 = vmax.xlane.f32.xlu1 %v761_v17 }
 0x3c4   : > { %v842_v19 = vpop.f32.mrf.mxu3 }
 0x3c5   : > { %v845_v20 = vsel %vm491_vm5, %v842_v19, -inf }
 0x3c6   : > { %846 = vmax.xlane.f32.xlu0 %v845_v20  ;;  %686 = vrot.lane.b32.xlu2 %v1800_v51, %s1613_s25 }
 0x3c7   : > { %930 = vmax.xlane.f32.xlu1 %v929_v21 }
 0x3cc   : > { %v1010_v22 = vpop.f32.mrf.mxu3 }
 0x3cd   : > { %v1013_v23 = vsel %vm491_vm5, %v1010_v22, -inf }
 0x3da   : > { %770 = vrot.lane.b32.xlu0 %v1800_v51, %s1617_s15 }
 0x3e0   : > { %854 = vrot.lane.b32.xlu1 %v1800_v51, %s1618_s13  ;;  %s2115_s13 = smov 40  }
 0x3e8   : > { %938 = vrot.lane.b32.xlu1 %v1800_v51, %s1614_s29  ;;  %s375_s29 = sand.u32 1, %s1596_s18  }
 0x3ef   : > { %1014 = vmax.xlane.f32.xlu2 %v1013_v23 }
 0x3f0   : > { %1022 = vrot.lane.b32.xlu1 %v1800_v51, %s1619_s14  ;;  %s2116_s14 = smov 32  }
 0x404   : > { %1098 = vmax.xlane.f32.xlu0 %v1097_v25 }
 0x407   : > { %1106 = vrot.lane.b32.xlu2 %v1800_v51, %s1616_s12  ;;  %s1441_s12 = sshll.u32 %s1703_s21, 3  ;;  %s1332_s21 = scalar_lea.sflag [#allocation4], %s375_s29 }
 0x421   : > { %v594_v26 = vpop.xlane.xlu2 %593 }
 0x422   : > { %v595_v27 = vsub.f32 %v589_v12, %v594_v26 }
 0x424   : > { %v596_v28 = vmul.f32 1.442695, %v595_v27 }
 0x426   : > { %1510 = vpow2.f32 %v596_v28 }
 0x429   : > { %v679_v29 = vpop.xlane.xlu0 %678  ;;  %v687_v30 = vpop.permute.xlu2 %686 }
 0x42a   : > { %v680_v31 = vsub.f32 %v674_v14, %v679_v29  ;;  %707 = vmatpush.msra.mxu2 %v687_v30 }
 0x42c   : > { %v1511_v32 = vpop.eup %1510  ;;  %v681_v33 = vmul.f32 1.442695, %v680_v31 }
 0x42d   : > { %1419 = vmatmul.msk.f32.vlgmr.msrb.gmra.mxu2 %vm491_vm5, %v1511_v32  ;;  %v598_v34 = vsel %vm491_vm5, %v1511_v32, 0.0 }
 0x42e   : > { %1512 = vpow2.f32 %v681_v33  ;;  %599 = vadd.xlane.f32.xlu1 %v598_v34 }
 0x431   : > { %v763_v35 = vpop.xlane.xlu1 %762 }
 0x432   : > { %v764_v36 = vsub.f32 %v758_v16, %v763_v35 }
 0x434   : > { %v1513_v37 = vpop.eup %1512  ;;  %v765_v38 = vmul.f32 1.442695, %v764_v36 }
 0x435   : > { %1422 = vmatmul.msk.f32.vlgmr.msra.gmra.mxu2 %vm491_vm5, %v1513_v37  ;;  %v683_v39 = vsel %vm491_vm5, %v1513_v37, 0.0 }
 0x436   : > { %1514 = vpow2.f32 %v765_v38  ;;  %684 = vadd.xlane.f32.xlu0 %v683_v39  ;;  %523 = vadd.xlane.f32.xlu1 %v522_v40 }
 0x439   : > { %v847_v41 = vpop.xlane.xlu0 %846 }
 0x43a   : > { %v848_v42 = vsub.f32 %v842_v19, %v847_v41  ;;  %v931_v43 = vpop.xlane.xlu1 %930 }
 0x43b   : > { %v932_v44 = vsub.f32 %v926_v18, %v931_v43 }
 0x43c   : > { %v1515_v45 = vpop.eup %1514  ;;  %v849_v46 = vmul.f32 1.442695, %v848_v42 }
 0x43d   : > { %v933_v47 = vmul.f32 1.442695, %v932_v44  ;;  %v767_v48 = vsel %vm491_vm5, %v1515_v45, 0.0 }
 0x43e   : > { %1516 = vpow2.f32 %v849_v46  ;;  %768 = vadd.xlane.f32.xlu0 %v767_v48 }
 0x43f   : > { %1518 = vpow2.f32 %v933_v47 }
 0x444   : > { %v1517_v49 = vpop.eup %1516 }
 0x445   : > { %v1519_v50 = vpop.eup %1518  ;;  %v851_v51 = vsel %vm491_vm5, %v1517_v49, 0.0 }
 0x446   : > { %852 = vadd.xlane.f32.xlu2 %v851_v51  ;;  %v935_v52 = vsel %vm491_vm5, %v1519_v50, 0.0 }
 0x447   : > { %936 = vadd.xlane.f32.xlu0 %v935_v52 }
 0x44c   : > { %v771_v53 = vpop.permute.xlu0 %770 }
 0x44d   : > { %791 = vmatpush.msrb.mxu2 %v771_v53 }
 0x44e   : > { %1425 = vmatmul.msk.f32.vlgmr.msrb.gmra.mxu2 %vm491_vm5, %v1515_v45 }
 0x452   : > { %v855_v54 = vpop.permute.xlu1 %854 }
 0x453   : > { %875 = vmatpush.msra.mxu2 %v855_v54 }
 0x456   : > { %1428 = vmatmul.msk.f32.vlgmr.msra.gmra.mxu2 %vm491_vm5, %v1517_v49 }
 0x45a   : > { %v939_v55 = vpop.permute.xlu1 %938 }
 0x45b   : > { %959 = vmatpush.msrb.mxu1 %v939_v55 }
 0x45c   : > { %1431 = vmatmul.msk.f32.vlgmr.msrb.gmra.mxu1 %vm491_vm5, %v1519_v50 }
 0x462   : > { %v1023_v56 = vpop.permute.xlu1 %1022  ;;  %v1015_v57 = vpop.xlane.xlu2 %1014 }
 0x463   : > { %v1016_v58 = vsub.f32 %v1010_v22, %v1015_v57  ;;  %1043 = vmatpush.msrb.mxu2 %v1023_v56 }
 0x465   : > { %v1017_v59 = vmul.f32 1.442695, %v1016_v58 }
 0x467   : > { %1520 = vpow2.f32 %v1017_v59 }
 0x46a   : > { %v1107_v60 = vpop.permute.xlu2 %1106 }
 0x46b   : > { %1127 = vmatpush.msra.mxu1 %v1107_v60 }
 0x46d   : > { %v1521_v61 = vpop.eup %1520 }
 0x46e   : > { %1434 = vmatmul.msk.f32.vlgmr.msrb.gmra.mxu2 %vm491_vm5, %v1521_v61  ;;  %v1019_v3 = vsel %vm491_vm5, %v1521_v61, 0.0 }
 0x477   : > { %v1099_v62 = vpop.xlane.xlu0 %1098 }
 0x478   : > { %v1100_v63 = vsub.f32 %v1858_v24, %v1099_v62 }
 0x47a   : > { %v1101_v0 = vmul.f32 1.442695, %v1100_v63 }
 0x47c   : > { %1522 = vpow2.f32 %v1101_v0 }
 0x482   : > { %v1523_v1 = vpop.eup %1522 }
 0x483   : > { %1437 = vmatmul.msk.f32.vlgmr.msra.gmra.mxu1 %vm491_vm5, %v1523_v1  ;;  %v1103_v2 = vsel %vm491_vm5, %v1523_v1, 0.0 }
 0x484   : > { %1104 = vadd.xlane.f32.xlu0 %v1103_v2 }
 0x48c   : > { %1020 = vadd.xlane.f32.xlu0 %v1019_v3 }
 0x4a1   : > { %v600_v4 = vpop.xlane.xlu1 %599 }
 0x4a2   : > { %1524 = vrcp.f32 %v600_v4  ;;  %v639_v12 = vand.u32 2147483648, %v600_v4  ;;  %v637_v14 = vand.u32 2147483647, %v600_v4  ;;  %vm633_vm7 = vweird.f32 %v600_v4 }
 0x4a4   : > { %v640_v18 = vor.u32 1.1754944e-38, %v639_v12  ;;  %vm638_vm9 = vcmp.eq.f32.partialorder %v637_v14, 8.507059e+37 }
 0x4a8   : > { %v1525_v5 = vpop.eup %1524 }
 0x4a9   : > { %v629_v6 = vmul.f32 %v1525_v5, %v600_v4  ;;  %v685_v7 = vpop.xlane.xlu0 %684  ;;  %v524_v9 = vpop.xlane.xlu1 %523  ;;  %vm634_vm6 = vweird.f32 %v1525_v5 }
 0x4aa   : > { %1526 = vrcp.f32 %v685_v7  ;;  %vm635_vm8 = vmor %vm633_vm7, %vm634_vm6  ;;  %v723_v28 = vand.u32 2147483648, %v685_v7  ;;  %v721_v30 = vand.u32 2147483647, %v685_v7  ;;  %vm717_vm11 = vweird.f32 %v685_v7 }
 0x4ab   : > { %v630_v10 = vsub.f32 1.0, %v629_v6  ;;  %1528 = vrcp.f32 %v524_v9  ;;  %v557_v33 = vand.u32 2147483647, %v524_v9  ;;  %v559_v34 = vand.u32 2147483648, %v524_v9 }
 0x4ac   : > { %v724_v35 = vor.u32 1.1754944e-38, %v723_v28  ;;  %vm722_vm14 = vcmp.eq.f32.partialorder %v721_v30, 8.507059e+37  ;;  %vm553_vm15 = vweird.f32 %v524_v9 }
 0x4ad   : > { %v631_v13 = vmul.f32 %v1525_v5, %v630_v10  ;;  %v560_v43 = vor.u32 1.1754944e-38, %v559_v34  ;;  %vm558_vm2 = vcmp.eq.f32.partialorder %v557_v33, 8.507059e+37 }
 0x4af   : > { %v632_v15 = vadd.f32 %v1525_v5, %v631_v13 }
 0x4b0   : > { %v1527_v16 = vpop.eup %1526  ;;  %v625_v17 = vpop.f32.mrf.mxu2 }
 0x4b1   : > { %v1529_v19 = vpop.eup %1528  ;;  %v713_v20 = vmul.f32 %v1527_v16, %v685_v7  ;;  %v636_v21 = vsel %vm635_vm8, %v1525_v5, %v632_v15  ;;  %v769_v22 = vpop.xlane.xlu0 %768  ;;  %vm718_vm10 = vweird.f32 %v1527_v16 }
 0x4b2   : > { %v549_v23 = vmul.f32 %v1529_v19, %v524_v9  ;;  %v641_v24 = vsel %vm638_vm9, %v640_v18, %v636_v21  ;;  %1530 = vrcp.f32 %v769_v22  ;;  %vm719_vm12 = vmor %vm717_vm11, %vm718_vm10  ;;  %vm554_vm13 = vweird.f32 %v1529_v19 }
 0x4b3   : > { %v714_v25 = vsub.f32 1.0, %v713_v20  ;;  %v642_v26 = vmul.f32 %v641_v24, %v625_v17  ;;  %vm555_vm1 = vmor %vm553_vm15, %vm554_vm13  ;;  %v807_v56 = vand.u32 2147483648, %v769_v22  ;;  %vm801_vm4 = vweird.f32 %v769_v22 }
 0x4b4   : > { %v550_v27 = vsub.f32 1.0, %v549_v23  ;;  %v805_v57 = vand.u32 2147483647, %v769_v22 }
 0x4b5   : > { %644 = vrot.lane.b32.xlu0 %v642_v26, %s1620_s16  ;;  %v715_v29 = vmul.f32 %v1527_v16, %v714_v25  ;;  %s2117_s16 = smov 56  }
 0x4b6   : > { %v551_v31 = vmul.f32 %v1529_v19, %v550_v27  ;;  %vm806_vm7 = vcmp.eq.f32.partialorder %v805_v57, 8.507059e+37 }
 0x4b7   : > { %v716_v32 = vadd.f32 %v1527_v16, %v715_v29 }
 0x4b8   : > { %v552_v36 = vadd.f32 %v1529_v19, %v551_v31  ;;  %v709_v38 = vpop.f32.mrf.mxu2  ;;  %v1531_v41 = vpop.eup %1530 }
 0x4b9   : > { %v720_v37 = vsel %vm719_vm12, %v1527_v16, %v716_v32  ;;  %v797_v45 = vmul.f32 %v1531_v41, %v769_v22  ;;  %v853_v49 = vpop.xlane.xlu2 %852  ;;  %vm802_vm3 = vweird.f32 %v1531_v41 }
 0x4ba   : > { %v725_v39 = vsel %vm722_vm14, %v724_v35, %v720_v37  ;;  %v937_v40 = vpop.xlane.xlu0 %936  ;;  %v556_v44 = vsel %vm555_vm1, %v1529_v19, %v552_v36  ;;  %vm803_vm6 = vmor %vm801_vm4, %vm802_vm3  ;;  %v891_v13 = vand.u32 2147483648, %v853_v49  ;;  %vm885_vm12 = vweird.f32 %v853_v49 }
 0x4bb   : > { %v726_v42 = vmul.f32 %v725_v39, %v709_v38  ;;  %1532 = vrcp.f32 %v937_v40  ;;  %v561_v46 = vsel %vm558_vm2, %v560_v43, %v556_v44  ;;  %v798_v48 = vsub.f32 1.0, %v797_v45 }
 0x4bc   : > { %v562_v47 = vmul.f32 %v561_v46, %v1840_v11  ;;  %1534 = vrcp.f32 %v853_v49  ;;  %v808_v11 = vor.u32 1.1754944e-38, %v807_v56  ;;  %v975_v2 = vand.u32 2147483648, %v937_v40 }
 0x4bd   : > { %728 = vrot.lane.b32.xlu1 %v726_v42, %s1612_s24  ;;  %v799_v52 = vmul.f32 %v1531_v41, %v798_v48  ;;  %vm969_vm8 = vweird.f32 %v937_v40  ;;  %v973_v3 = vand.u32 2147483647, %v937_v40  ;;  %v889_v14 = vand.u32 2147483647, %v853_v49 }
 0x4be   : > { %563 = vst.msk [vmem:[#allocation2] sm:$0xff] %vm491_vm5, %v562_v47  ;;  %v976_v6 = vor.u32 1.1754944e-38, %v975_v2  ;;  %v892_v17 = vor.u32 1.1754944e-38, %v891_v13  ;;  %v1195_v2 = vld [vmem:[%s2102_s7 + $0x48] sm:$0xff]  ;;  %v1268_v13 = vld [vmem:[%s2104_s9 + $0x78] sm:$0xff] }
 0x4bf   : > { %v800_v54 = vadd.f32 %v1531_v41, %v799_v52  ;;  %vm974_vm10 = vcmp.eq.f32.partialorder %v973_v3, 8.507059e+37  ;;  %vm890_vm14 = vcmp.eq.f32.partialorder %v889_v14, 8.507059e+37  ;;  %v1192_v3 = vld [vmem:[%s2102_s7 + $0x30] sm:$0xff]  ;;  %v1284_v14 = vld [vmem:[%s2104_s9 + $0xf8] sm:$0xff]  ;;  %1289 = vmatpush.msrb.mxu0 %v1268_v13 }
 0x4c0   : > { %1309 = vmatpush.msrb.mxu1 %v1284_v14 }
 0x4c1   : > { %v1533_v50 = vpop.eup %1532  ;;  %v804_v59 = vsel %vm803_vm6, %v1531_v41, %v800_v54 }
 0x4c2   : > { %v965_v51 = vmul.f32 %v1533_v50, %v937_v40  ;;  %v1535_v55 = vpop.eup %1534  ;;  %v809_v62 = vsel %vm806_vm7, %v808_v11, %v804_v59  ;;  %vm970_vm5 = vweird.f32 %v1533_v50  ;;  %v1201_v11 = vld [vmem:[%s2102_s7 + $0x78] sm:$0xff] }
 0x4c3   : > { %v881_v58 = vmul.f32 %v1535_v55, %v853_v49  ;;  %vm971_vm9 = vmor %vm969_vm8, %vm970_vm5  ;;  %vm886_vm11 = vweird.f32 %v1535_v55  ;;  %vm647_vm8 = vcmask 130112   ;;  %1239 = vmatpush.msra.mxu2 %v1201_v11 }
 0x4c4   : > { %v966_v53 = vsub.f32 1.0, %v965_v51  ;;  %vm887_vm13 = vmor %vm885_vm12, %vm886_vm11  ;;  %vm899_vm11 = vcmask 326912   ;;  %vm983_vm12 = vcmask 392512  }
 0x4c5   : > { %v882_v63 = vsub.f32 1.0, %v881_v58 }
 0x4c6   : > { %v967_v60 = vmul.f32 %v1533_v50, %v966_v53 }
 0x4c7   : > { %v883_v5 = vmul.f32 %v1535_v55, %v882_v63  ;;  %v1196_v63 = vld [vmem:[%s2102_s7 + $0x50] sm:$0xff] }
 0x4c8   : > { %v968_v1 = vadd.f32 %v1533_v50, %v967_v60  ;;  %v1200_v60 = vld [vmem:[%s2102_s7 + $0x70] sm:$0xff] }
 0x4c9   : > { %v884_v12 = vadd.f32 %v1535_v55, %v883_v5  ;;  %1219 = vmatpush.msra.mxu3 %v1200_v60  ;;  %v1190_v5 = vld [vmem:[%s2102_s7 + $0x20] sm:$0xff] }
 0x4ca   : > { %v972_v4 = vsel %vm971_vm9, %v1533_v50, %v968_v1  ;;  %vm731_vm9 = vcmask 195712   ;;  %v1194_v1 = vld [vmem:[%s2102_s7 + $0x40] sm:$0xff] }
 0x4cb   : > { %v977_v9 = vsel %vm974_vm10, %v976_v6, %v972_v4  ;;  %v888_v15 = vsel %vm887_vm13, %v1535_v55, %v884_v12  ;;  %vm815_vm10 = vcmask 261312   ;;  %vm1067_vm13 = vcmask 458112   ;;  %v1193_v4 = vld [vmem:[%s2102_s7 + $0x38] sm:$0xff]  ;;  %v1191_v6 = vld [vmem:[%s2102_s7 + $0x28] sm:$0xff]  ;;  %v1202_v60 = vld [vmem:[%s2103_s8] sm:$0x3] }
 0x4cc   : > { %v893_v18 = vsel %vm890_vm14, %v892_v17, %v888_v15  ;;  %vm1151_vm14 = vcmask 523712   ;;  %v1187_v12 = vld [vmem:[%s2102_s7 + $0x8] sm:$0xff]  ;;  %v1267_v15 = vld [vmem:[%s2104_s9 + $0x70] sm:$0xff]  ;;  %v1204_v11 = vperm.slane %v1202_v60, 0 }
 0x4cd   : > { %1290 = vmatpush.msrb.mxu0 %v1267_v15 }
 0x4d1   : > { %v793_v61 = vpop.f32.mrf.mxu2 }
 0x4d2   : > { %v810_v0 = vmul.f32 %v809_v62, %v793_v61  ;;  %v1198_v61 = vld [vmem:[%s2102_s7 + $0x60] sm:$0xff]  ;;  %v1199_v62 = vld [vmem:[%s2102_s7 + $0x68] sm:$0xff] }
 0x4d3   : > { %1220 = vmatpush.msra.mxu3 %v1198_v61  ;;  %1240 = vmatpush.msra.mxu2 %v1199_v62  ;;  %v1205_v61 = vperm.slane %v1202_v60, 1 }
 0x4d4   : > { %812 = vrot.lane.b32.xlu2 %v810_v0, %s1621_s30  ;;  %v1197_v0 = vld [vmem:[%s2102_s7 + $0x58] sm:$0xff]  ;;  %s1410_s30 = sshll.u32 %s375_s29, 3 }
 0x4d5   : > { %1221 = vmatpush.msra.mxu3 %v1196_v63  ;;  %1241 = vmatpush.msra.mxu2 %v1197_v0  ;;  %s377_s24 = scalar_lea.vmem [#allocation3], %s1410_s30  ;;  %s1562_s30 = scalar_lea.hbm %s2106_s11, 16 }
 0x4d6   : > { %s1344_s25 = sshll.u32 %s377_s24, 4  ;;  %s1345_s25 = int_to_ptr.vmem [resolvable:$true] %s1344_s25 }
 0x4d7   : > { %1222 = vmatpush.msra.mxu3 %v1194_v1  ;;  %1242 = vmatpush.msra.mxu2 %v1195_v2 }
 0x4d9   : > { %v961_v7 = vpop.f32.mrf.mxu1  ;;  %v877_v16 = vpop.f32.mrf.mxu2  ;;  %1223 = vmatpush.msra.mxu3 %v1192_v3  ;;  %1243 = vmatpush.msra.mxu2 %v1193_v4  ;;  %v1503_v4 = vld [vmem:[%s2105_s10] ss:$0 sm:$0xff] }
 0x4da   : > { %v978_v10 = vmul.f32 %v977_v9, %v961_v7  ;;  %v894_v19 = vmul.f32 %v893_v18, %v877_v16  ;;  %v1188_v7 = vld [vmem:[%s2102_s7 + $0x10] sm:$0xff]  ;;  %v1189_v9 = vld [vmem:[%s2102_s7 + $0x18] sm:$0xff]  ;;  %v1266_v18 = vld [vmem:[%s2104_s9 + $0x68] sm:$0xff] }
 0x4db   : > { %1224 = vmatpush.msra.mxu3 %v1190_v5  ;;  %1244 = vmatpush.msra.mxu2 %v1191_v6  ;;  %v1283_v16 = vld [vmem:[%s2104_s9 + $0xf0] sm:$0xff] }
 0x4dc   : > { %980 = vrot.lane.b32.xlu0 %v978_v10, %s2115_s13  ;;  %v1186_v10 = vld [vmem:[%s2102_s7] sm:$0xff]  ;;  %1310 = vmatpush.msrb.mxu1 %v1283_v16 }
 0x4dd   : > { %1225 = vmatpush.msra.mxu3 %v1188_v7  ;;  %1245 = vmatpush.msra.mxu2 %v1189_v9 }
 0x4de   : > { %1291 = vmatpush.msrb.mxu0 %v1266_v18 }
 0x4df   : > { %1226 = vmatpush.msra.mxu3 %v1186_v10  ;;  %1246 = vmatpush.msra.mxu2 %v1187_v12 }
 0x4e4   : > { %896 = vrot.lane.b32.xlu0 %v894_v19, %s2116_s14  ;;  %v1282_v19 = vld [vmem:[%s2104_s9 + $0xe8] sm:$0xff] }
 0x4e5   : > { %1311 = vmatpush.msrb.mxu1 %v1282_v19 }
 0x4f1   : > { %v1045_v43 = vpop.f32.mrf.mxu2 }
 0x4f7   : > { %v1105_v20 = vpop.xlane.xlu0 %1104 }
 0x4f8   : > { %1536 = vrcp.f32 %v1105_v20  ;;  %v1143_v25 = vand.u32 2147483648, %v1105_v20  ;;  %v1141_v27 = vand.u32 2147483647, %v1105_v20  ;;  %vm1137_vm1 = vweird.f32 %v1105_v20 }
 0x4fa   : > { %v1144_v30 = vor.u32 1.1754944e-38, %v1143_v25  ;;  %vm1142_vm3 = vcmp.eq.f32.partialorder %v1141_v27, 8.507059e+37  ;;  %v1263_v25 = vld [vmem:[%s2104_s9 + $0x50] sm:$0xff]  ;;  %v1262_v27 = vld [vmem:[%s2104_s9 + $0x48] sm:$0xff] }
 0x4fe   : > { %v1537_v21 = vpop.eup %1536 }
 0x4ff   : > { %v1133_v22 = vmul.f32 %v1537_v21, %v1105_v20  ;;  %v1021_v23 = vpop.xlane.xlu0 %1020  ;;  %vm1138_vm15 = vweird.f32 %v1537_v21 }
 0x500   : > { %1538 = vrcp.f32 %v1021_v23  ;;  %vm1139_vm2 = vmor %vm1137_vm1, %vm1138_vm15  ;;  %v1129_v33 = vpop.f32.mrf.mxu1  ;;  %v1059_v37 = vand.u32 2147483648, %v1021_v23  ;;  %v1057_v39 = vand.u32 2147483647, %v1021_v23  ;;  %vm1053_vm6 = vweird.f32 %v1021_v23 }
 0x501   : > { %v1134_v24 = vsub.f32 1.0, %v1133_v22  ;;  %v1281_v22 = vld [vmem:[%s2104_s9 + $0xe0] sm:$0xff] }
 0x502   : > { %v1060_v41 = vor.u32 1.1754944e-38, %v1059_v37  ;;  %vm1058_vm5 = vcmp.eq.f32.partialorder %v1057_v39, 8.507059e+37  ;;  %1312 = vmatpush.msrb.mxu1 %v1281_v22  ;;  %v1275_v37 = vld [vmem:[%s2104_s9 + $0xb0] sm:$0xff]  ;;  %v1258_v39 = vld [vmem:[%s2104_s9 + $0x28] sm:$0xff] }
 0x503   : > { %v1135_v26 = vmul.f32 %v1537_v21, %v1134_v24  ;;  %v1264_v24 = vld [vmem:[%s2104_s9 + $0x58] sm:$0xff] }
 0x505   : > { %v1136_v28 = vadd.f32 %v1537_v21, %v1135_v26  ;;  %v1279_v26 = vld [vmem:[%s2104_s9 + $0xd0] sm:$0xff] }
 0x506   : > { %v1539_v29 = vpop.eup %1538 }
 0x507   : > { %v1049_v31 = vmul.f32 %v1539_v29, %v1021_v23  ;;  %v1140_v32 = vsel %vm1139_vm2, %v1537_v21, %v1136_v28  ;;  %vm1054_vm4 = vweird.f32 %v1539_v29  ;;  %v1265_v21 = vld [vmem:[%s2104_s9 + $0x60] sm:$0xff]  ;;  %v1278_v28 = vld [vmem:[%s2104_s9 + $0xc8] sm:$0xff] }
 0x508   : > { %v1145_v34 = vsel %vm1142_vm3, %v1144_v30, %v1140_v32  ;;  %vm1055_vm7 = vmor %vm1053_vm6, %vm1054_vm4  ;;  %1292 = vmatpush.msrb.mxu0 %v1265_v21  ;;  %v1277_v30 = vld [vmem:[%s2104_s9 + $0xc0] sm:$0xff] }
 0x509   : > { %v1050_v35 = vsub.f32 1.0, %v1049_v31  ;;  %v1146_v36 = vmul.f32 %v1145_v34, %v1129_v33  ;;  %v1260_v33 = vld [vmem:[%s2104_s9 + $0x38] sm:$0xff] }
 0x50a   : > { %1293 = vmatpush.msrb.mxu0 %v1264_v24  ;;  %v1276_v34 = vld [vmem:[%s2104_s9 + $0xb8] sm:$0xff] }
 0x50b   : > { %v1051_v38 = vmul.f32 %v1539_v29, %v1050_v35  ;;  %1148 = vrot.lane.b32.xlu0 %v1146_v36, %s2117_s16  ;;  %v1259_v36 = vld [vmem:[%s2104_s9 + $0x30] sm:$0xff] }
 0x50c   : > { %1294 = vmatpush.msrb.mxu0 %v1263_v25 }
 0x50d   : > { %v1052_v40 = vadd.f32 %v1539_v29, %v1051_v38 }
 0x50e   : > { %1295 = vmatpush.msrb.mxu0 %v1262_v27 }
 0x50f   : > { %v1056_v42 = vsel %vm1055_vm7, %v1539_v29, %v1052_v40  ;;  %v1261_v29 = vld [vmem:[%s2104_s9 + $0x40] sm:$0xff]  ;;  %v1274_v40 = vld [vmem:[%s2104_s9 + $0xa8] sm:$0xff] }
 0x510   : > { %v1061_v44 = vsel %vm1058_vm5, %v1060_v41, %v1056_v42  ;;  %1296 = vmatpush.msrb.mxu0 %v1261_v29  ;;  %v1257_v42 = vld [vmem:[%s2104_s9 + $0x20] sm:$0xff] }
 0x511   : > { %v1062_v45 = vmul.f32 %v1061_v44, %v1045_v43  ;;  %v1273_v43 = vld [vmem:[%s2104_s9 + $0xa0] sm:$0xff] }
 0x512   : > { %1297 = vmatpush.msrb.mxu0 %v1260_v33 }
 0x513   : > { %1064 = vrot.lane.b32.xlu1 %v1062_v45, %s2118_s22  ;;  %v1256_v45 = vld [vmem:[%s2104_s9 + $0x18] sm:$0xff]  ;;  %s1342_s22 = scalar_lea.hbm %s2106_s11, %s1441_s12 }
 0x514   : > { %1298 = vmatpush.msrb.mxu0 %v1259_v36  ;;  %s1346_s0 = sshll.u32 %s1342_s22, 4  ;;  %s1347_s0 = int_to_ptr.hbm [resolvable:$true] %s1346_s0 }
 0x515   : > { %s1556_s15 = sshra.s32 %s1347_s0, 4  ;;  %s1557_s15 = int_to_ptr.hbm [resolvable:$true] %s1556_s15 }
 0x516   : > { %1299 = vmatpush.msrb.mxu0 %v1258_v39  ;;  %s1558_s13 = scalar_lea.hbm %s1557_s15, 8  ;;  %p1563_p0 = scmp.lt.s32.totalorder %s1557_s15, %s2106_s11 }
 0x517   : > { %p1559_p11 = scmp.ne.s32.totalorder %s1557_s15, %s1558_s13  ;;  %p1564_p1 = scmp.lt.s32.totalorder %s1562_s30, %s1558_s13 }
 0x518   : > { %1300 = vmatpush.msrb.mxu0 %v1257_v42 }
 0x519   : > { %p1560_p12 = pnand %p1559_p11, %p1720_p5  ;;  %p1565_p2 = por %p1564_p1, %p1563_p0 }
 0x51a   : > { %1301 = vmatpush.msrb.mxu0 %v1256_v45 }
 0x51b   : > { %p1561_p13 = pneg %p1560_p12 }
 0x51d   : > { %p1566_p3 = pnand %p1565_p2, %p1561_p13 }
 0x527   : > { %v645_v46 = vpop.permute.xlu0 %644 }
 0x528   : > { %648 = vst.msk [vmem:[#allocation2] sm:$0xff] %vm647_vm8, %v645_v46  ;;  %v1272_v46 = vld [vmem:[%s2104_s9 + $0x98] sm:$0xff] }
 0x52e   : > { %v813_v48 = vpop.permute.xlu2 %812 }
 0x52f   : > { %v729_v47 = vpop.permute.xlu1 %728 }
 0x530   : > { %732 = vst.msk [vmem:[#allocation2] sm:$0xff] %vm731_vm9, %v729_v47  ;;  %v1501_v47 = vld [vmem:[%s2100_s5] ss:$0 sm:$0xff] }
 0x531   : > { %816 = vst.msk [vmem:[#allocation2] sm:$0xff] %vm815_vm10, %v813_v48 }
 0x54e   : > { %v981_v49 = vpop.permute.xlu0 %980 }
 0x556   : > { %v897_v50 = vpop.permute.xlu0 %896 }
 0x557   : > { %900 = vst.msk [vmem:[#allocation2] sm:$0xff] %vm899_vm11, %v897_v50  ;;  %v1502_v50 = vld [vmem:[%s2101_s6] ss:$0 sm:$0xff] }
 0x558   : > { %984 = vst.msk [vmem:[#allocation2] sm:$0xff] %vm983_vm12, %v981_v49 }
 0x57d   : > { %v1149_v52 = vpop.permute.xlu0 %1148 }
 0x585   : > { %v1065_v51 = vpop.permute.xlu1 %1064 }
 0x586   : > { %1068 = vst.msk [vmem:[#allocation2] sm:$0xff] %vm1067_vm13, %v1065_v51 }
 0x587   : > { %1152 = vst.msk [vmem:[#allocation2] sm:$0xff] %vm1151_vm14, %v1149_v52 }
 0x58e   : > { %v1890_v53 = vld [vmem:[#allocation2] sm:$0xff] }
 0x58f   : > { %v1156_v54 = vsel %vm385_vm0, %v1890_v53, 0.0 }
 0x590   : > { %1157 = vadd.xlane.f32.xlu1 %v1156_v54  ;;  %v1255_v54 = vld [vmem:[%s2104_s9 + $0x10] sm:$0xff] }
 0x591   : > { %1302 = vmatpush.msrb.mxu0 %v1255_v54 }
 0x603   : > { %v1158_v55 = vpop.xlane.xlu1 %1157 }
 0x604   : > { %v1159_v56 = vmul.f32 %v1158_v55, %v1736_v8  ;;  %v1271_v55 = vld [vmem:[%s2104_s9 + $0x90] sm:$0xff] }
 0x606   : > { %v1896_v57 = vsub.f32 %v1890_v53, %v1159_v56  ;;  %v1254_v56 = vld [vmem:[%s2104_s9 + $0x8] sm:$0xff] }
 0x607   : > { %1303 = vmatpush.msrb.mxu0 %v1254_v56 }
 0x608   : > { %v1161_v58 = vmul.f32 %v1896_v57, %v1896_v57 }
 0x60a   : > { %v1162_v59 = vsel %vm385_vm0, %v1161_v58, 0.0  ;;  %v1253_v58 = vld [vmem:[%s2104_s9] sm:$0xff] }
 0x60b   : > { %1163 = vadd.xlane.f32.xlu2 %v1162_v59  ;;  %v1269_v59 = vld [vmem:[%s2104_s9 + $0x80] sm:$0xff]  ;;  %1304 = vmatpush.msrb.mxu0 %v1253_v58 }
 0x67e   : > { %v1164_v17 = vpop.xlane.xlu2 %1163 }
 0x67f   : > { %v1165_v20 = vmul.f32 %v1164_v17, %v1736_v8  ;;  %v1280_v8 = vld [vmem:[%s2104_s9 + $0xd8] sm:$0xff] }
 0x680   : > { %1313 = vmatpush.msrb.mxu1 %v1280_v8 }
 0x681   : > { %v1166_v23 = vadd.f32 1e-05, %v1165_v20 }
 0x682   : > { %1314 = vmatpush.msrb.mxu1 %v1279_v26 }
 0x683   : > { %1540 = vrsqrt.f32 %v1166_v23  ;;  %vm1173_vm1 = vweird.f32 %v1166_v23 }
 0x684   : > { %1315 = vmatpush.msrb.mxu1 %v1278_v28 }
 0x686   : > { %1316 = vmatpush.msrb.mxu1 %v1277_v30 }
 0x688   : > { %1317 = vmatpush.msrb.mxu1 %v1276_v34 }
 0x689   : > { %v1541_v31 = vpop.eup %1540 }
 0x68a   : > { %v1168_v32 = vmul.f32 %v1541_v31, %v1166_v23  ;;  %1318 = vmatpush.msrb.mxu1 %v1275_v37  ;;  %vm1174_vm15 = vweird.f32 %v1541_v31 }
 0x68b   : > { %vm1175_vm2 = vmor %vm1173_vm1, %vm1174_vm15 }
 0x68c   : > { %v1169_v35 = vmul.f32 %v1541_v31, %v1168_v32  ;;  %1319 = vmatpush.msrb.mxu1 %v1274_v40 }
 0x68e   : > { %v1170_v38 = vmul.f32 0.5, %v1169_v35  ;;  %1320 = vmatpush.msrb.mxu1 %v1273_v43 }
 0x690   : > { %v1171_v41 = vsub.f32 1.5, %v1170_v38  ;;  %1321 = vmatpush.msrb.mxu1 %v1272_v46 }
 0x692   : > { %v1172_v44 = vmul.f32 %v1541_v31, %v1171_v41  ;;  %1322 = vmatpush.msrb.mxu1 %v1271_v55 }
 0x694   : > { %v1176_v48 = vsel %vm1175_vm2, %v1541_v31, %v1172_v44 }
 0x695   : > { %v1177_v49 = vmul.f32 %v1176_v48, %v1896_v57  ;;  %v1270_v57 = vld [vmem:[%s2104_s9 + $0x88] sm:$0xff] }
 0x696   : > { %1323 = vmatpush.msrb.mxu1 %v1270_v57 }
 0x697   : > { %v1181_v51 = vmul.f32 %v1501_v47, %v1177_v49 }
 0x698   : > { %1324 = vmatpush.msrb.mxu1 %v1269_v59 }
 0x699   : > { %v1185_v52 = vadd.f32 %v1502_v50, %v1181_v51 }
 0x69b   : > { %1438 = vmatmul.msk.f32.vlgmr.msra.gmra.mxu3 %vm385_vm0, %v1185_v52  ;;  %1439 = vmatmul.msk.f32.vlgmr.msra.gmra.mxu2 %vm385_vm0, %v1185_v52 }
 0x71e   : > { %v1228_v62 = vpop.f32.mrf.mxu3  ;;  %v1248_v63 = vpop.f32.mrf.mxu2 }
 0x71f   : > { %v1229_v0 = vadd.f32 %v1228_v62, %v1204_v11  ;;  %v1249_v1 = vadd.f32 %v1248_v63, %v1205_v61 }
 0x721   : > { %v1251_v2 = vmax.f32 %v1229_v0, 0.0  ;;  %v1252_v3 = vmax.f32 %v1249_v1, 0.0 }
 0x723   : > { %1305 = vmatmul.f32.vlgmr.msrb.gmra.mxu0 %v1251_v2  ;;  %1325 = vmatmul.f32.vlgmr.msrb.gmra.mxu1 %v1252_v3 }
 0x7a0   : > { %v1306_v5 = vpop.f32.mrf.mxu0  ;;  %v1326_v7 = vpop.f32.mrf.mxu1 }
 0x7a1   : > { %v1307_v6 = vadd.f32 %v1503_v4, %v1306_v5 }
 0x7a3   : > { %v1327_v9 = vadd.f32 %v1326_v7, %v1307_v6 }
 0x7a5   : > { %v1329_v10 = vadd.f32 %v1327_v9, %v1890_v53 }
 0x7a7   : > { %1330 = vst.msk [vmem:[%s377_s24] sm:$0xff] %vm385_vm0, %v1329_v10 }
 0x7a8   : > { %1569 = shalt.err (!%p1566_p3)
}
 0x7a9   : > { %1444 = dma.vmem_to_hbm [thread:$0]  (%p1720_p5), %s1345_s25, 128, %s1347_s0, %s1332_s21  }
 0x7aa PF: > { %p1450_p4 = scmp.ge.s32.totalorder %s1604_s20, 2  ;;  %s1358_s29 = sand.u32 1, %s1592_s17  }
 0x7ab   : > { %s1359_s24 = scalar_lea.sflag [#allocation4], %s1358_s29 }
 0x7ac   : > { %p1447_p7 = pnand %p1450_p4, %p1724_p6 }
 0x7ae   : > { %p1448_p8 = pneg %p1447_p7 }
 0x7b0   : > { %1587 = dma.done.wait (%p1448_p8), %s1359_s24, 128  }
 0x7b1   : > { %1589 = vsyncadd (%p1448_p8), %s1359_s24, 4294967168  ;;  %p21_p9 = scmp.ge.s32.totalorder %s1707_s23, 4   ;;  %s2119_s17 = smov %s1596_s18 }
 0x7b2   : > { %s2120_s18 = smov %s1600_s19  ;;  %s2121_s19 = smov %s1718_s26 }
 0x7b3   : > { %s2122_s20 = smov %s1707_s23  ;;  %23 = sbr.rel (!%p21_p9) target bundleno = 5 (0x5), region = 99 }
 0x7b8   :  { %1365 = vsyncpa [#allocation4], 1 }
 0x7b9   :  { %1367 = vsyncpa [#allocation4 + $0x1], 1 }

</bundles_post_ra>
